<compile_context>
chip_gen: v7x
topology: tpu7x:2x2x1
jax: 0.10.0
libtpu: 0.0.40
codegen_flags: <defaults>
</compile_context>

<pallas_src>
import math
import functools

import jax
import jax.numpy as jnp
from jax.experimental import pallas as pl
from jax.experimental.pallas import tpu as pltpu

# ----------------------- config (mirrors BSARec args) -----------------------
BATCH = 2
SEQ = 8
HIDDEN = 32
NUM_HEADS = 2
NUM_LAYERS = 2          # args.num_hidden_layers
INTERMEDIATE = 4 * HIDDEN
ALPHA = 0.7             # args.alpha
C = 3                   # args.c  (FrequencyLayer keeps c//2 + 1 rfft bins)
LN_EPS = 1e-12
# hidden_dropout_prob / attention_probs_dropout_prob -> identity (eval mode)

# rows of the per-layer (9, H) vector slab
# 0: sqrt_beta**2, 1: ln1_w, 2: ln1_b, 3: bd, 4: ln2_w, 5: ln2_b, 6: b2, 7: ln3_w, 8: ln3_b


# ----------------------------- in-kernel helpers -----------------------------
def _layer_norm(x, w, b):
    u = jnp.mean(x, axis=-1, keepdims=True)
    s = jnp.mean((x - u) * (x - u), axis=-1, keepdims=True)
    return w * ((x - u) / jnp.sqrt(s + LN_EPS)) + b


def _gelu_tanh(x):
    # tanh-form GELU: runs on the EUP slot instead of a VALU-heavy erf polynomial.
    # TODO(synk): PyTorch's gelu uses exact erf; tanh form deviates by <~1e-3.
    c = math.sqrt(2.0 / math.pi)
    return 0.5 * x * (1.0 + jnp.tanh(c * (x + 0.044715 * (x * x * x))))


# --------------------------------- kernel -----------------------------------
def _bsarec_fused_kernel(
    x_ref, lp_ref, mask_ref,
    wqkv_ref, wd_ref, bqkv_ref, w1_ref, w2_ref, b1_ref, vec_ref,
    out_ref,
    h_ref,
    *, alpha, num_heads, store_all):
    """Grid step (b, l): apply BSARecBlock l to batch b's resident (S, H) hidden state."""
    layer = pl.program_id(1)
    num_layers = pl.num_programs(1)

    @pl.when(layer == 0)
    def _init():
        h_ref[...] = x_ref[...].astype(jnp.float32)

    x = h_ref[...]                                   # (S, H), resident across layers
    S, H = x.shape
    dh = H // num_heads
    scale = 1.0 / math.sqrt(dh)

    vecs = vec_ref[layer]                            # (9, H)
    beta_sq = vecs[0:1]
    ln1_w, ln1_b = vecs[1:2], vecs[2:3]
    bd = vecs[3:4]
    ln2_w, ln2_b = vecs[4:5], vecs[5:6]
    b2 = vecs[6:7]
    ln3_w, ln3_b = vecs[7:8], vecs[8:9]

    # ---------------- FrequencyLayer (dsp) ----------------
    low = jnp.dot(lp_ref[...], x, preferred_element_type=jnp.float32)   # (S, H)
    seq_fft = low + beta_sq * (x - low)
    dsp = _layer_norm(seq_fft + x, ln1_w, ln1_b)

    # ---------------- MultiHeadAttention (gsp) ----------------
    # Per-head static loop; head split/merge is folded into host-side weight packing,
    # so activations are never sliced/stacked along the lane dim.
    mask = mask_ref[...]                              # (S, S) additive (causal/padding)
    b_l = bqkv_ref[layer]                             # (3*nh, dh): rows t*nh + h
    qkv_base = layer * (3 * num_heads)
    wd_base = layer * num_heads

    attn = jnp.zeros((S, H), jnp.float32)
    for h in range(num_heads):
        q_h = jnp.dot(x, wqkv_ref[qkv_base + h],
                      preferred_element_type=jnp.float32) + b_l[h]
        k_h = jnp.dot(x, wqkv_ref[qkv_base + num_heads + h],
                      preferred_element_type=jnp.float32) + b_l[num_heads + h]
        v_h = jnp.dot(x, wqkv_ref[qkv_base + 2 * num_heads + h],
                      preferred_element_type=jnp.float32) + b_l[2 * num_heads + h]

        s_h = jnp.einsum("qd,kd->qk", q_h, k_h,
                         preferred_element_type=jnp.float32) * scale + mask
        s_h = s_h - jnp.max(s_h, axis=-1, keepdims=True)
        e_h = jnp.exp(s_h)
        p_h = e_h * pl.reciprocal(jnp.sum(e_h, axis=-1, keepdims=True), approx=True)
        ctx_h = jnp.dot(p_h, v_h, preferred_element_type=jnp.float32)   # (S, dh)

        # head merge folded into the output projection: sum_h ctx_h @ Wd_h
        attn = attn + jnp.dot(ctx_h, wd_ref[wd_base + h],
                              preferred_element_type=jnp.float32)
    attn = attn + bd
    gsp = _layer_norm(attn + x, ln2_w, ln2_b)

    h1 = alpha * dsp + (1.0 - alpha) * gsp

    # ---------------- FeedForward ----------------
    f = jnp.dot(h1, w1_ref[layer], preferred_element_type=jnp.float32) + b1_ref[layer]
    f = _gelu_tanh(f)
    f = jnp.dot(f, w2_ref[layer], preferred_element_type=jnp.float32) + b2
    new_h = _layer_norm(f + h1, ln3_w, ln3_b)

    h_ref[...] = new_h                                # stays resident for next layer

    if store_all:
        out_ref[...] = new_h.astype(out_ref.dtype)    # per-layer output block
    else:
        @pl.when(layer == num_layers - 1)
        def _store():
            out_ref[...] = new_h.astype(out_ref.dtype)


# ------------------------------ param packing --------------------------------
def _pack_layer_params(layer_params, num_heads):
    """Pack per-layer params into flat slabs; head split/merge is done here (host)."""
    L = len(layer_params)
    H = layer_params[0]["wq"].shape[0]
    dh = H // num_heads

    def per_head(w):                                  # (H, H) -> (nh, H, dh)
        return jnp.transpose(w.reshape(H, num_heads, dh), (1, 0, 2))

    wqkv_list, wd_list, bqkv_list, vec_list = [], [], [], []
    for p in layer_params:
        wqkv_list.append(jnp.concatenate(
            [per_head(p["wq"]), per_head(p["wk"]), per_head(p["wv"])], axis=0))
        wd_list.append(p["wd"].reshape(num_heads, dh, H))
        bqkv_list.append(jnp.stack(
            [p["bq"].reshape(num_heads, dh),
             p["bk"].reshape(num_heads, dh),
             p["bv"].reshape(num_heads, dh)], axis=0).reshape(3 * num_heads, dh))
        vec_list.append(jnp.concatenate(
            [p["sqrt_beta"] ** 2,                      # precomputed square
             p["ln1_w"], p["ln1_b"], p["bd"],
             p["ln2_w"], p["ln2_b"], p["b2"],
             p["ln3_w"], p["ln3_b"]], axis=0))

    wqkv_h = jnp.stack(wqkv_list, 0).reshape(L * 3 * num_heads, H, dh)   # flat: l*3nh+t*nh+h
    wd_h = jnp.stack(wd_list, 0).reshape(L * num_heads, dh, H)           # flat: l*nh+h
    bqkv = jnp.stack(bqkv_list, 0)                                       # (L, 3*nh, dh)
    vecs = jnp.stack(vec_list, 0)                                        # (L, 9, H)
    w1 = jnp.stack([p["w1"] for p in layer_params], 0)                   # (L, H, I)
    w2 = jnp.stack([p["w2"] for p in layer_params], 0)                   # (L, I, H)
    b1 = jnp.stack([p["b1"] for p in layer_params], 0)                   # (L, 1, I)
    return wqkv_h, wd_h, bqkv, w1, w2, b1, vecs


# --------------------------------- wrapper -----------------------------------
def bsarec_encoder(hidden_states, attention_mask, layer_params, lowpass_seq,
                   *, alpha=ALPHA, num_heads=NUM_HEADS,
                   output_all_encoded_layers=False):
    """Mirrors BSARecEncoder.forward with one fused Pallas kernel for all layers."""
    B, S, H = hidden_states.shape
    L = len(layer_params)

    lp = lowpass_seq.astype(jnp.float32)                         # (S, S), shared
    mask_bs = attention_mask[:, 0].astype(jnp.float32)           # (B, S, S) additive

    wqkv_h, wd_h, bqkv, w1, w2, b1, vecs = _pack_layer_params(layer_params, num_heads)
    I = w1.shape[-1]

    # constant index maps -> these operands are DMA'd into VMEM once for the whole call
    c2 = lambda b, l: (0, 0)
    c3 = lambda b, l: (0, 0, 0)

    if output_all_encoded_layers:
        out_shape = jax.ShapeDtypeStruct((B, L, S, H), hidden_states.dtype)
        out_spec = pl.BlockSpec((None, None, S, H), lambda b, l: (b, l, 0, 0))
    else:
        out_shape = jax.ShapeDtypeStruct((B, S, H), hidden_states.dtype)
        out_spec = pl.BlockSpec((None, S, H), lambda b, l: (b, 0, 0))

    kern = functools.partial(_bsarec_fused_kernel, alpha=alpha, num_heads=num_heads,
                             store_all=output_all_encoded_layers)
    grid_spec = pltpu.PrefetchScalarGridSpec(
        num_scalar_prefetch=0,
        grid=(B, L),
        in_specs=[
            pl.BlockSpec((None, S, H), lambda b, l: (b, 0, 0)),   # hidden state (per b)
            pl.BlockSpec((S, S), c2),                             # low-pass operator
            pl.BlockSpec((None, S, S), lambda b, l: (b, 0, 0)),   # additive mask (per b)
            pl.BlockSpec(wqkv_h.shape, c3),                       # per-(layer,head) Q/K/V
            pl.BlockSpec(wd_h.shape, c3),                         # per-(layer,head) out proj
            pl.BlockSpec(bqkv.shape, c3),                         # per-head q/k/v biases
            pl.BlockSpec(w1.shape, c3),                           # FFN up
            pl.BlockSpec(w2.shape, c3),                           # FFN down
            pl.BlockSpec(b1.shape, c3),                           # FFN up bias
            pl.BlockSpec(vecs.shape, c3),                         # packed H-vectors
        ],
        out_specs=out_spec,
        scratch_shapes=[pltpu.VMEM((S, H), jnp.float32)],         # resident hidden state
    )
    result = pl.pallas_call(
        kern,
        out_shape=out_shape,
        grid_spec=grid_spec,
        compiler_params=pltpu.CompilerParams(
            dimension_semantics=("parallel", "arbitrary"),
            vmem_limit_bytes=32 * 1024 * 1024),
    )(hidden_states, lp, mask_bs, wqkv_h, wd_h, bqkv, w1, w2, b1, vecs)

    all_encoder_layers = [hidden_states]
    if output_all_encoded_layers:
        all_encoder_layers.extend([result[:, i] for i in range(L)])
    else:
        all_encoder_layers.append(result)
    return all_encoder_layers


# ------------------------------ glue / params -------------------------------
def lowpass_filter_matrix(seq_len, c_arg):
    """Matrix equivalent of rfft -> zero bins >= c//2+1 -> irfft along seq axis."""
    c_keep = c_arg // 2 + 1
    eye = jnp.eye(seq_len, dtype=jnp.float32)
    spec = jnp.fft.rfft(eye, axis=0, norm="ortho")
    spec = spec.at[c_keep:, :].set(0)
    mat = jnp.fft.irfft(spec, n=seq_len, axis=0, norm="ortho")
    return mat.astype(jnp.float32)            # low = mat @ x  (per sequence)


def init_layer_params(key, hidden, intermediate):
    # Linear weights stored as (in, out) == PyTorch nn.Linear weight transposed.
    ks = jax.random.split(key, 13)
    n = lambda k, shape, s=0.02: s * jax.random.normal(k, shape, jnp.float32)
    ones = jnp.ones((1, hidden), jnp.float32)
    zeros = jnp.zeros((1, hidden), jnp.float32)
    return {
        "sqrt_beta": jax.random.normal(ks[0], (1, hidden), jnp.float32),
        "ln1_w": ones, "ln1_b": zeros,
        "wq": n(ks[1], (hidden, hidden)), "bq": n(ks[2], (1, hidden)),
        "wk": n(ks[3], (hidden, hidden)), "bk": n(ks[4], (1, hidden)),
        "wv": n(ks[5], (hidden, hidden)), "bv": n(ks[6], (1, hidden)),
        "wd": n(ks[7], (hidden, hidden)), "bd": n(ks[8], (1, hidden)),
        "ln2_w": ones, "ln2_b": zeros,
        "w1": n(ks[9], (hidden, intermediate)), "b1": n(ks[10], (1, intermediate)),
        "w2": n(ks[11], (intermediate, hidden)), "b2": n(ks[12], (1, hidden)),
        "ln3_w": ones, "ln3_b": zeros,
    }


# ------------------------- pure-JAX reference (check) ------------------------
def _ref_block(x, mask, c_keep, p, alpha=ALPHA, num_heads=NUM_HEADS):
    B, S, H = x.shape
    dh = H // num_heads
    spec = jnp.fft.rfft(x, axis=1, norm="ortho")
    spec = spec.at[:, c_keep:, :].set(0)
    low = jnp.fft.irfft(spec, n=S, axis=1, norm="ortho")
    high = x - low
    seq_fft = low + (p["sqrt_beta"] ** 2) * high
    dsp = _layer_norm(seq_fft + x, p["ln1_w"], p["ln1_b"])

    q = (x @ p["wq"] + p["bq"]).reshape(B, S, num_heads, dh).transpose(0, 2, 1, 3)
    k = (x @ p["wk"] + p["bk"]).reshape(B, S, num_heads, dh).transpose(0, 2, 1, 3)
    v = (x @ p["wv"] + p["bv"]).reshape(B, S, num_heads, dh).transpose(0, 2, 1, 3)
    scores = jnp.einsum("bhqd,bhkd->bhqk", q, k) / math.sqrt(dh) + mask
    probs = jax.nn.softmax(scores, axis=-1)
    ctx = jnp.einsum("bhqk,bhkd->bhqd", probs, v).transpose(0, 2, 1, 3).reshape(B, S, H)
    attn = ctx @ p["wd"] + p["bd"]
    gsp = _layer_norm(attn + x, p["ln2_w"], p["ln2_b"])

    h1 = alpha * dsp + (1.0 - alpha) * gsp
    f = h1 @ p["w1"] + p["b1"]
    f = f * 0.5 * (1.0 + jax.scipy.special.erf(f / math.sqrt(2.0)))   # exact erf GELU
    f = f @ p["w2"] + p["b2"]
    return _layer_norm(f + h1, p["ln3_w"], p["ln3_b"])


# ----------------------------------- main ------------------------------------
if __name__ == "__main__":
    key = jax.random.PRNGKey(0)
    k_x, k_p = jax.random.split(key)

    hidden_states = jax.random.normal(k_x, (BATCH, SEQ, HIDDEN), jnp.float32)

    # BSARec-style extended additive attention mask (causal, no padding): 0 / -10000
    causal = jnp.tril(jnp.ones((SEQ, SEQ), jnp.float32))
    attention_mask = jnp.broadcast_to(
        ((1.0 - causal) * -10000.0)[None, None, :, :], (BATCH, 1, SEQ, SEQ))

    layer_keys = jax.random.split(k_p, NUM_LAYERS)
    layer_params = [init_layer_params(k, HIDDEN, INTERMEDIATE) for k in layer_keys]
    lowpass = lowpass_filter_matrix(SEQ, C)

    outs = bsarec_encoder(hidden_states, attention_mask, layer_params, lowpass,
                          output_all_encoded_layers=False)
    final = jax.block_until_ready(outs[-1])

    # sanity check against a pure-JAX reference of the same math (exact erf / exact
    # softmax divide); tolerance 2e-3 allows the tanh-GELU + approx-reciprocal paths.
    c_keep = C // 2 + 1
    ref = hidden_states
    for p in layer_params:
        ref = _ref_block(ref, attention_mask, c_keep, p)
    max_err = float(jnp.max(jnp.abs(final - ref)))
    assert max_err < 2e-3, f"mismatch vs reference: {max_err}"

    print("KERNEL_OK")
</pallas_src>

<mosaic_0001>
module attributes {stable_mosaic.version = 11 : i64} {
  func.func @_bsarec_fused_kernel(%arg0: i32, %arg1: i32, %arg2: memref<1x8x32xf32, #tpu.memory_space<vmem>>, %arg3: memref<8x8xf32, #tpu.memory_space<vmem>>, %arg4: memref<1x8x8xf32, #tpu.memory_space<vmem>>, %arg5: memref<12x32x16xf32, #tpu.memory_space<vmem>>, %arg6: memref<4x16x32xf32, #tpu.memory_space<vmem>>, %arg7: memref<2x6x16xf32, #tpu.memory_space<vmem>>, %arg8: memref<2x32x128xf32, #tpu.memory_space<vmem>>, %arg9: memref<2x128x32xf32, #tpu.memory_space<vmem>>, %arg10: memref<2x1x128xf32, #tpu.memory_space<vmem>>, %arg11: memref<2x9x32xf32, #tpu.memory_space<vmem>>, %arg12: memref<1x8x32xf32, #tpu.memory_space<vmem>>, %arg13: memref<8x32xf32, #tpu.memory_space<vmem>>) attributes {dimension_semantics = [#tpu.dimension_semantics<parallel>, #tpu.dimension_semantics<arbitrary>], iteration_bounds = array<i64: 2, 2>, scalar_prefetch = 0 : i64, scratch_operands = 1 : i64, tpu.core_type = #tpu.core_type<tc>, window_params = [{transform_indices = @transform_0, window_bounds = array<i64: 1, 8, 32>}, {pipeline_mode = #tpu.pipeline_mode<synchronous>, transform_indices = @transform_1, window_bounds = array<i64: 8, 8>}, {transform_indices = @transform_2, window_bounds = array<i64: 1, 8, 8>}, {pipeline_mode = #tpu.pipeline_mode<synchronous>, transform_indices = @transform_3, window_bounds = array<i64: 12, 32, 16>}, {pipeline_mode = #tpu.pipeline_mode<synchronous>, transform_indices = @transform_4, window_bounds = array<i64: 4, 16, 32>}, {pipeline_mode = #tpu.pipeline_mode<synchronous>, transform_indices = @transform_5, window_bounds = array<i64: 2, 6, 16>}, {pipeline_mode = #tpu.pipeline_mode<synchronous>, transform_indices = @transform_6, window_bounds = array<i64: 2, 32, 128>}, {pipeline_mode = #tpu.pipeline_mode<synchronous>, transform_indices = @transform_7, window_bounds = array<i64: 2, 128, 32>}, {pipeline_mode = #tpu.pipeline_mode<synchronous>, transform_indices = @transform_8, window_bounds = array<i64: 2, 1, 128>}, {pipeline_mode = #tpu.pipeline_mode<synchronous>, transform_indices = @transform_9, window_bounds = array<i64: 2, 9, 32>}, {transform_indices = @transform_10, window_bounds = array<i64: 1, 8, 32>}]} {
    %c0_i32 = arith.constant 0 : i32
    %0 = arith.cmpi eq, %arg1, %c0_i32 : i32
    %1 = arith.extui %0 : i1 to i32
    %c0_i32_0 = arith.constant 0 : i32
    %2 = arith.cmpi ne, %1, %c0_i32_0 : i32
    scf.if %2 {
      %c0_89 = arith.constant 0 : index
      %c0_90 = arith.constant 0 : index
      %c0_91 = arith.constant 0 : index
      %250 = vector.load %arg2[%c0_89, %c0_90, %c0_91] : memref<1x8x32xf32, #tpu.memory_space<vmem>>, vector<1x8x32xf32>
      %251 = vector.shape_cast %250 : vector<1x8x32xf32> to vector<8x32xf32>
      %c0_92 = arith.constant 0 : index
      %c0_93 = arith.constant 0 : index
      %252 = vector.load %arg13[%c0_92, %c0_93] : memref<8x32xf32, #tpu.memory_space<vmem>>, vector<8x32xf32>
      tpu.vector_store %arg13[%c0_92, %c0_93], %251 {strides = array<i32>} : memref<8x32xf32, #tpu.memory_space<vmem>>, vector<8x32xf32>,
    } else {
    }
    %c0 = arith.constant 0 : index
    %c0_1 = arith.constant 0 : index
    %3 = vector.load %arg13[%c0, %c0_1] : memref<8x32xf32, #tpu.memory_space<vmem>>, vector<8x32xf32>
    %4 = arith.index_cast %arg1 : i32 to index
    %c0_2 = arith.constant 0 : index
    %c0_3 = arith.constant 0 : index
    %5 = vector.load %arg11[%4, %c0_2, %c0_3] : memref<2x9x32xf32, #tpu.memory_space<vmem>>, vector<1x9x32xf32>
    %6 = vector.shape_cast %5 : vector<1x9x32xf32> to vector<9x32xf32>
    %7 = vector.extract_strided_slice %6 {offsets = [0, 0], sizes = [1, 32], strides = [1, 1]} : vector<9x32xf32> to vector<1x32xf32>
    %8 = vector.extract_strided_slice %6 {offsets = [1, 0], sizes = [1, 32], strides = [1, 1]} : vector<9x32xf32> to vector<1x32xf32>
    %9 = vector.extract_strided_slice %6 {offsets = [2, 0], sizes = [1, 32], strides = [1, 1]} : vector<9x32xf32> to vector<1x32xf32>
    %10 = vector.extract_strided_slice %6 {offsets = [3, 0], sizes = [1, 32], strides = [1, 1]} : vector<9x32xf32> to vector<1x32xf32>
    %11 = vector.extract_strided_slice %6 {offsets = [4, 0], sizes = [1, 32], strides = [1, 1]} : vector<9x32xf32> to vector<1x32xf32>
    %12 = vector.extract_strided_slice %6 {offsets = [5, 0], sizes = [1, 32], strides = [1, 1]} : vector<9x32xf32> to vector<1x32xf32>
    %13 = vector.extract_strided_slice %6 {offsets = [6, 0], sizes = [1, 32], strides = [1, 1]} : vector<9x32xf32> to vector<1x32xf32>
    %14 = vector.extract_strided_slice %6 {offsets = [7, 0], sizes = [1, 32], strides = [1, 1]} : vector<9x32xf32> to vector<1x32xf32>
    %15 = vector.extract_strided_slice %6 {offsets = [8, 0], sizes = [1, 32], strides = [1, 1]} : vector<9x32xf32> to vector<1x32xf32>
    %c0_4 = arith.constant 0 : index
    %c0_5 = arith.constant 0 : index
    %16 = vector.load %arg3[%c0_4, %c0_5] : memref<8x8xf32, #tpu.memory_space<vmem>>, vector<8x8xf32>
    %cst = arith.constant dense<0.000000e+00> : vector<8x32xf32>
    %17 = tpu.matmul %16, %3, %cst {dimension_numbers = #tpu.dot_dimension_numbers<[1], [0], [0], [1], [0, 0, 1, 1], [], []>} : vector<8x8xf32>, vector<8x32xf32>, vector<8x32xf32> -> vector<8x32xf32>
    %18 = arith.subf %3, %17 : vector<8x32xf32>
    %19 = vector.broadcast %7 : vector<1x32xf32> to vector<8x32xf32>
    %20 = arith.mulf %19, %18 : vector<8x32xf32>
    %21 = arith.addf %17, %20 : vector<8x32xf32>
    %22 = arith.addf %21, %3 : vector<8x32xf32>
    %cst_6 = arith.constant dense<0.000000e+00> : vector<8xf32>
    %23 = vector.multi_reduction <add>, %22, %cst_6 [1] : vector<8x32xf32> to vector<8xf32>
    %24 = vector.shape_cast %23 : vector<8xf32> to vector<8x1xf32>
    %cst_7 = arith.constant 3.200000e+01 : f32
    %25 = vector.broadcast %cst_7 : f32 to vector<8x1xf32>
    %26 = arith.divf %24, %25 : vector<8x1xf32>
    %27 = vector.broadcast %26 : vector<8x1xf32> to vector<8x32xf32>
    %28 = arith.subf %22, %27 : vector<8x32xf32>
    %29 = vector.broadcast %26 : vector<8x1xf32> to vector<8x32xf32>
    %30 = arith.subf %22, %29 : vector<8x32xf32>
    %31 = arith.mulf %28, %30 : vector<8x32xf32>
    %cst_8 = arith.constant dense<0.000000e+00> : vector<8xf32>
    %32 = vector.multi_reduction <add>, %31, %cst_8 [1] : vector<8x32xf32> to vector<8xf32>
    %33 = vector.shape_cast %32 : vector<8xf32> to vector<8x1xf32>
    %cst_9 = arith.constant 3.200000e+01 : f32
    %34 = vector.broadcast %cst_9 : f32 to vector<8x1xf32>
    %35 = arith.divf %33, %34 : vector<8x1xf32>
    %36 = vector.broadcast %26 : vector<8x1xf32> to vector<8x32xf32>
    %37 = arith.subf %22, %36 : vector<8x32xf32>
    %cst_10 = arith.constant 9.99999996E-13 : f32
    %38 = vector.broadcast %cst_10 : f32 to vector<8x1xf32>
    %39 = arith.addf %35, %38 : vector<8x1xf32>
    %40 = math.sqrt %39 : vector<8x1xf32>
    %41 = vector.broadcast %40 : vector<8x1xf32> to vector<8x32xf32>
    %42 = arith.divf %37, %41 : vector<8x32xf32>
    %43 = vector.broadcast %8 : vector<1x32xf32> to vector<8x32xf32>
    %44 = arith.mulf %43, %42 : vector<8x32xf32>
    %45 = vector.broadcast %9 : vector<1x32xf32> to vector<8x32xf32>
    %46 = arith.addf %44, %45 : vector<8x32xf32>
    %c0_11 = arith.constant 0 : index
    %c0_12 = arith.constant 0 : index
    %c0_13 = arith.constant 0 : index
    %47 = vector.load %arg4[%c0_11, %c0_12, %c0_13] : memref<1x8x8xf32, #tpu.memory_space<vmem>>, vector<1x8x8xf32>
    %48 = vector.shape_cast %47 : vector<1x8x8xf32> to vector<8x8xf32>
    %49 = arith.index_cast %arg1 : i32 to index
    %c0_14 = arith.constant 0 : index
    %c0_15 = arith.constant 0 : index
    %50 = vector.load %arg7[%49, %c0_14, %c0_15] : memref<2x6x16xf32, #tpu.memory_space<vmem>>, vector<1x6x16xf32>
    %51 = vector.shape_cast %50 : vector<1x6x16xf32> to vector<6x16xf32>
    %c6_i32 = arith.constant 6 : i32
    %52 = arith.muli %arg1, %c6_i32 : i32
    %c2_i32 = arith.constant 2 : i32
    %53 = arith.muli %arg1, %c2_i32 : i32
    %cst_16 = arith.constant 0.000000e+00 : f32
    %54 = vector.broadcast %cst_16 : f32 to vector<8x32xf32>
    %c0_i32_17 = arith.constant 0 : i32
    %55 = arith.addi %52, %c0_i32_17 : i32
    %56 = arith.index_cast %55 : i32 to index
    %c0_18 = arith.constant 0 : index
    %c0_19 = arith.constant 0 : index
    %57 = vector.load %arg5[%56, %c0_18, %c0_19] : memref<12x32x16xf32, #tpu.memory_space<vmem>>, vector<1x32x16xf32>
    %58 = vector.shape_cast %57 : vector<1x32x16xf32> to vector<32x16xf32>
    %cst_20 = arith.constant dense<0.000000e+00> : vector<8x16xf32>
    %59 = tpu.matmul %3, %58, %cst_20 {dimension_numbers = #tpu.dot_dimension_numbers<[1], [0], [0], [1], [0, 0, 1, 1], [], []>} : vector<8x32xf32>, vector<32x16xf32>, vector<8x16xf32> -> vector<8x16xf32>
    %60 = vector.extract_strided_slice %51 {offsets = [0, 0], sizes = [1, 16], strides = [1, 1]} : vector<6x16xf32> to vector<1x16xf32>
    %61 = vector.shape_cast %60 : vector<1x16xf32> to vector<16xf32>
    %62 = vector.shape_cast %61 : vector<16xf32> to vector<1x16xf32>
    %63 = vector.broadcast %62 : vector<1x16xf32> to vector<8x16xf32>
    %64 = arith.addf %59, %63 : vector<8x16xf32>
    %c2_i32_21 = arith.constant 2 : i32
    %65 = arith.addi %52, %c2_i32_21 : i32
    %c0_i32_22 = arith.constant 0 : i32
    %66 = arith.addi %65, %c0_i32_22 : i32
    %67 = arith.index_cast %66 : i32 to index
    %c0_23 = arith.constant 0 : index
    %c0_24 = arith.constant 0 : index
    %68 = vector.load %arg5[%67, %c0_23, %c0_24] : memref<12x32x16xf32, #tpu.memory_space<vmem>>, vector<1x32x16xf32>
    %69 = vector.shape_cast %68 : vector<1x32x16xf32> to vector<32x16xf32>
    %cst_25 = arith.constant dense<0.000000e+00> : vector<8x16xf32>
    %70 = tpu.matmul %3, %69, %cst_25 {dimension_numbers = #tpu.dot_dimension_numbers<[1], [0], [0], [1], [0, 0, 1, 1], [], []>} : vector<8x32xf32>, vector<32x16xf32>, vector<8x16xf32> -> vector<8x16xf32>
    %71 = vector.extract_strided_slice %51 {offsets = [2, 0], sizes = [1, 16], strides = [1, 1]} : vector<6x16xf32> to vector<1x16xf32>
    %72 = vector.shape_cast %71 : vector<1x16xf32> to vector<16xf32>
    %73 = vector.shape_cast %72 : vector<16xf32> to vector<1x16xf32>
    %74 = vector.broadcast %73 : vector<1x16xf32> to vector<8x16xf32>
    %75 = arith.addf %70, %74 : vector<8x16xf32>
    %c4_i32 = arith.constant 4 : i32
    %76 = arith.addi %52, %c4_i32 : i32
    %c0_i32_26 = arith.constant 0 : i32
    %77 = arith.addi %76, %c0_i32_26 : i32
    %78 = arith.index_cast %77 : i32 to index
    %c0_27 = arith.constant 0 : index
    %c0_28 = arith.constant 0 : index
    %79 = vector.load %arg5[%78, %c0_27, %c0_28] : memref<12x32x16xf32, #tpu.memory_space<vmem>>, vector<1x32x16xf32>
    %80 = vector.shape_cast %79 : vector<1x32x16xf32> to vector<32x16xf32>
    %cst_29 = arith.constant dense<0.000000e+00> : vector<8x16xf32>
    %81 = tpu.matmul %3, %80, %cst_29 {dimension_numbers = #tpu.dot_dimension_numbers<[1], [0], [0], [1], [0, 0, 1, 1], [], []>} : vector<8x32xf32>, vector<32x16xf32>, vector<8x16xf32> -> vector<8x16xf32>
    %82 = vector.extract_strided_slice %51 {offsets = [4, 0], sizes = [1, 16], strides = [1, 1]} : vector<6x16xf32> to vector<1x16xf32>
    %83 = vector.shape_cast %82 : vector<1x16xf32> to vector<16xf32>
    %84 = vector.shape_cast %83 : vector<16xf32> to vector<1x16xf32>
    %85 = vector.broadcast %84 : vector<1x16xf32> to vector<8x16xf32>
    %86 = arith.addf %81, %85 : vector<8x16xf32>
    "tpu.trace_start"() <{level = 10 : i32, message = "qd,kd->qk"}> : () -> ()
    %cst_30 = arith.constant dense<0.000000e+00> : vector<8x8xf32>
    %87 = tpu.matmul %64, %75, %cst_30 {dimension_numbers = #tpu.dot_dimension_numbers<[1], [1], [0], [0], [0, 0, 1, 0], [], []>} : vector<8x16xf32>, vector<8x16xf32>, vector<8x8xf32> -> vector<8x8xf32>
    "tpu.trace_stop"() : () -> ()
    %cst_31 = arith.constant 2.500000e-01 : f32
    %88 = vector.broadcast %cst_31 : f32 to vector<8x8xf32>
    %89 = arith.mulf %87, %88 : vector<8x8xf32>
    %90 = arith.addf %89, %48 : vector<8x8xf32>
    %cst_32 = arith.constant dense<0xFF800000> : vector<8xf32>
    %91 = vector.multi_reduction <maximumf>, %90, %cst_32 [1] : vector<8x8xf32> to vector<8xf32>
    %92 = vector.shape_cast %91 : vector<8xf32> to vector<8x1xf32>
    %93 = vector.broadcast %92 : vector<8x1xf32> to vector<8x8xf32>
    %94 = arith.subf %90, %93 : vector<8x8xf32>
    %95 = math.exp %94 : vector<8x8xf32>
    %cst_33 = arith.constant dense<0.000000e+00> : vector<8xf32>
    %96 = vector.multi_reduction <add>, %95, %cst_33 [1] : vector<8x8xf32> to vector<8xf32>
    %97 = vector.shape_cast %96 : vector<8xf32> to vector<8x1xf32>
    %98 = tpu.reciprocal %97 {approx = true} : vector<8x1xf32> -> vector<8x1xf32>
    %99 = vector.broadcast %98 : vector<8x1xf32> to vector<8x8xf32>
    %100 = arith.mulf %95, %99 : vector<8x8xf32>
    %cst_34 = arith.constant dense<0.000000e+00> : vector<8x16xf32>
    %101 = tpu.matmul %100, %86, %cst_34 {dimension_numbers = #tpu.dot_dimension_numbers<[1], [0], [0], [1], [0, 0, 1, 1], [], []>} : vector<8x8xf32>, vector<8x16xf32>, vector<8x16xf32> -> vector<8x16xf32>
    %c0_i32_35 = arith.constant 0 : i32
    %102 = arith.addi %53, %c0_i32_35 : i32
    %103 = arith.index_cast %102 : i32 to index
    %c0_36 = arith.constant 0 : index
    %c0_37 = arith.constant 0 : index
    %104 = vector.load %arg6[%103, %c0_36, %c0_37] : memref<4x16x32xf32, #tpu.memory_space<vmem>>, vector<1x16x32xf32>
    %105 = vector.shape_cast %104 : vector<1x16x32xf32> to vector<16x32xf32>
    %cst_38 = arith.constant dense<0.000000e+00> : vector<8x32xf32>
    %106 = tpu.matmul %101, %105, %cst_38 {dimension_numbers = #tpu.dot_dimension_numbers<[1], [0], [0], [1], [0, 0, 1, 1], [], []>} : vector<8x16xf32>, vector<16x32xf32>, vector<8x32xf32> -> vector<8x32xf32>
    %107 = arith.addf %54, %106 : vector<8x32xf32>
    %c1_i32 = arith.constant 1 : i32
    %108 = arith.addi %52, %c1_i32 : i32
    %109 = arith.index_cast %108 : i32 to index
    %c0_39 = arith.constant 0 : index
    %c0_40 = arith.constant 0 : index
    %110 = vector.load %arg5[%109, %c0_39, %c0_40] : memref<12x32x16xf32, #tpu.memory_space<vmem>>, vector<1x32x16xf32>
    %111 = vector.shape_cast %110 : vector<1x32x16xf32> to vector<32x16xf32>
    %cst_41 = arith.constant dense<0.000000e+00> : vector<8x16xf32>
    %112 = tpu.matmul %3, %111, %cst_41 {dimension_numbers = #tpu.dot_dimension_numbers<[1], [0], [0], [1], [0, 0, 1, 1], [], []>} : vector<8x32xf32>, vector<32x16xf32>, vector<8x16xf32> -> vector<8x16xf32>
    %113 = vector.extract_strided_slice %51 {offsets = [1, 0], sizes = [1, 16], strides = [1, 1]} : vector<6x16xf32> to vector<1x16xf32>
    %114 = vector.shape_cast %113 : vector<1x16xf32> to vector<16xf32>
    %115 = vector.shape_cast %114 : vector<16xf32> to vector<1x16xf32>
    %116 = vector.broadcast %115 : vector<1x16xf32> to vector<8x16xf32>
    %117 = arith.addf %112, %116 : vector<8x16xf32>
    %c2_i32_42 = arith.constant 2 : i32
    %118 = arith.addi %52, %c2_i32_42 : i32
    %c1_i32_43 = arith.constant 1 : i32
    %119 = arith.addi %118, %c1_i32_43 : i32
    %120 = arith.index_cast %119 : i32 to index
    %c0_44 = arith.constant 0 : index
    %c0_45 = arith.constant 0 : index
    %121 = vector.load %arg5[%120, %c0_44, %c0_45] : memref<12x32x16xf32, #tpu.memory_space<vmem>>, vector<1x32x16xf32>
    %122 = vector.shape_cast %121 : vector<1x32x16xf32> to vector<32x16xf32>
    %cst_46 = arith.constant dense<0.000000e+00> : vector<8x16xf32>
    %123 = tpu.matmul %3, %122, %cst_46 {dimension_numbers = #tpu.dot_dimension_numbers<[1], [0], [0], [1], [0, 0, 1, 1], [], []>} : vector<8x32xf32>, vector<32x16xf32>, vector<8x16xf32> -> vector<8x16xf32>
    %124 = vector.extract_strided_slice %51 {offsets = [3, 0], sizes = [1, 16], strides = [1, 1]} : vector<6x16xf32> to vector<1x16xf32>
    %125 = vector.shape_cast %124 : vector<1x16xf32> to vector<16xf32>
    %126 = vector.shape_cast %125 : vector<16xf32> to vector<1x16xf32>
    %127 = vector.broadcast %126 : vector<1x16xf32> to vector<8x16xf32>
    %128 = arith.addf %123, %127 : vector<8x16xf32>
    %c4_i32_47 = arith.constant 4 : i32
    %129 = arith.addi %52, %c4_i32_47 : i32
    %c1_i32_48 = arith.constant 1 : i32
    %130 = arith.addi %129, %c1_i32_48 : i32
    %131 = arith.index_cast %130 : i32 to index
    %c0_49 = arith.constant 0 : index
    %c0_50 = arith.constant 0 : index
    %132 = vector.load %arg5[%131, %c0_49, %c0_50] : memref<12x32x16xf32, #tpu.memory_space<vmem>>, vector<1x32x16xf32>
    %133 = vector.shape_cast %132 : vector<1x32x16xf32> to vector<32x16xf32>
    %cst_51 = arith.constant dense<0.000000e+00> : vector<8x16xf32>
    %134 = tpu.matmul %3, %133, %cst_51 {dimension_numbers = #tpu.dot_dimension_numbers<[1], [0], [0], [1], [0, 0, 1, 1], [], []>} : vector<8x32xf32>, vector<32x16xf32>, vector<8x16xf32> -> vector<8x16xf32>
    %135 = vector.extract_strided_slice %51 {offsets = [5, 0], sizes = [1, 16], strides = [1, 1]} : vector<6x16xf32> to vector<1x16xf32>
    %136 = vector.shape_cast %135 : vector<1x16xf32> to vector<16xf32>
    %137 = vector.shape_cast %136 : vector<16xf32> to vector<1x16xf32>
    %138 = vector.broadcast %137 : vector<1x16xf32> to vector<8x16xf32>
    %139 = arith.addf %134, %138 : vector<8x16xf32>
    "tpu.trace_start"() <{level = 10 : i32, message = "qd,kd->qk"}> : () -> ()
    %cst_52 = arith.constant dense<0.000000e+00> : vector<8x8xf32>
    %140 = tpu.matmul %117, %128, %cst_52 {dimension_numbers = #tpu.dot_dimension_numbers<[1], [1], [0], [0], [0, 0, 1, 0], [], []>} : vector<8x16xf32>, vector<8x16xf32>, vector<8x8xf32> -> vector<8x8xf32>
    "tpu.trace_stop"() : () -> ()
    %cst_53 = arith.constant 2.500000e-01 : f32
    %141 = vector.broadcast %cst_53 : f32 to vector<8x8xf32>
    %142 = arith.mulf %140, %141 : vector<8x8xf32>
    %143 = arith.addf %142, %48 : vector<8x8xf32>
    %cst_54 = arith.constant dense<0xFF800000> : vector<8xf32>
    %144 = vector.multi_reduction <maximumf>, %143, %cst_54 [1] : vector<8x8xf32> to vector<8xf32>
    %145 = vector.shape_cast %144 : vector<8xf32> to vector<8x1xf32>
    %146 = vector.broadcast %145 : vector<8x1xf32> to vector<8x8xf32>
    %147 = arith.subf %143, %146 : vector<8x8xf32>
    %148 = math.exp %147 : vector<8x8xf32>
    %cst_55 = arith.constant dense<0.000000e+00> : vector<8xf32>
    %149 = vector.multi_reduction <add>, %148, %cst_55 [1] : vector<8x8xf32> to vector<8xf32>
    %150 = vector.shape_cast %149 : vector<8xf32> to vector<8x1xf32>
    %151 = tpu.reciprocal %150 {approx = true} : vector<8x1xf32> -> vector<8x1xf32>
    %152 = vector.broadcast %151 : vector<8x1xf32> to vector<8x8xf32>
    %153 = arith.mulf %148, %152 : vector<8x8xf32>
    %cst_56 = arith.constant dense<0.000000e+00> : vector<8x16xf32>
    %154 = tpu.matmul %153, %139, %cst_56 {dimension_numbers = #tpu.dot_dimension_numbers<[1], [0], [0], [1], [0, 0, 1, 1], [], []>} : vector<8x8xf32>, vector<8x16xf32>, vector<8x16xf32> -> vector<8x16xf32>
    %c1_i32_57 = arith.constant 1 : i32
    %155 = arith.addi %53, %c1_i32_57 : i32
    %156 = arith.index_cast %155 : i32 to index
    %c0_58 = arith.constant 0 : index
    %c0_59 = arith.constant 0 : index
    %157 = vector.load %arg6[%156, %c0_58, %c0_59] : memref<4x16x32xf32, #tpu.memory_space<vmem>>, vector<1x16x32xf32>
    %158 = vector.shape_cast %157 : vector<1x16x32xf32> to vector<16x32xf32>
    %cst_60 = arith.constant dense<0.000000e+00> : vector<8x32xf32>
    %159 = tpu.matmul %154, %158, %cst_60 {dimension_numbers = #tpu.dot_dimension_numbers<[1], [0], [0], [1], [0, 0, 1, 1], [], []>} : vector<8x16xf32>, vector<16x32xf32>, vector<8x32xf32> -> vector<8x32xf32>
    %160 = arith.addf %107, %159 : vector<8x32xf32>
    %161 = vector.broadcast %10 : vector<1x32xf32> to vector<8x32xf32>
    %162 = arith.addf %160, %161 : vector<8x32xf32>
    %163 = arith.addf %162, %3 : vector<8x32xf32>
    %cst_61 = arith.constant dense<0.000000e+00> : vector<8xf32>
    %164 = vector.multi_reduction <add>, %163, %cst_61 [1] : vector<8x32xf32> to vector<8xf32>
    %165 = vector.shape_cast %164 : vector<8xf32> to vector<8x1xf32>
    %cst_62 = arith.constant 3.200000e+01 : f32
    %166 = vector.broadcast %cst_62 : f32 to vector<8x1xf32>
    %167 = arith.divf %165, %166 : vector<8x1xf32>
    %168 = vector.broadcast %167 : vector<8x1xf32> to vector<8x32xf32>
    %169 = arith.subf %163, %168 : vector<8x32xf32>
    %170 = vector.broadcast %167 : vector<8x1xf32> to vector<8x32xf32>
    %171 = arith.subf %163, %170 : vector<8x32xf32>
    %172 = arith.mulf %169, %171 : vector<8x32xf32>
    %cst_63 = arith.constant dense<0.000000e+00> : vector<8xf32>
    %173 = vector.multi_reduction <add>, %172, %cst_63 [1] : vector<8x32xf32> to vector<8xf32>
    %174 = vector.shape_cast %173 : vector<8xf32> to vector<8x1xf32>
    %cst_64 = arith.constant 3.200000e+01 : f32
    %175 = vector.broadcast %cst_64 : f32 to vector<8x1xf32>
    %176 = arith.divf %174, %175 : vector<8x1xf32>
    %177 = vector.broadcast %167 : vector<8x1xf32> to vector<8x32xf32>
    %178 = arith.subf %163, %177 : vector<8x32xf32>
    %cst_65 = arith.constant 9.99999996E-13 : f32
    %179 = vector.broadcast %cst_65 : f32 to vector<8x1xf32>
    %180 = arith.addf %176, %179 : vector<8x1xf32>
    %181 = math.sqrt %180 : vector<8x1xf32>
    %182 = vector.broadcast %181 : vector<8x1xf32> to vector<8x32xf32>
    %183 = arith.divf %178, %182 : vector<8x32xf32>
    %184 = vector.broadcast %11 : vector<1x32xf32> to vector<8x32xf32>
    %185 = arith.mulf %184, %183 : vector<8x32xf32>
    %186 = vector.broadcast %12 : vector<1x32xf32> to vector<8x32xf32>
    %187 = arith.addf %185, %186 : vector<8x32xf32>
    %cst_66 = arith.constant 0.699999988 : f32
    %188 = vector.broadcast %cst_66 : f32 to vector<8x32xf32>
    %189 = arith.mulf %188, %46 : vector<8x32xf32>
    %cst_67 = arith.constant 3.000000e-01 : f32
    %190 = vector.broadcast %cst_67 : f32 to vector<8x32xf32>
    %191 = arith.mulf %190, %187 : vector<8x32xf32>
    %192 = arith.addf %189, %191 : vector<8x32xf32>
    %193 = arith.index_cast %arg1 : i32 to index
    %c0_68 = arith.constant 0 : index
    %c0_69 = arith.constant 0 : index
    %194 = vector.load %arg8[%193, %c0_68, %c0_69] : memref<2x32x128xf32, #tpu.memory_space<vmem>>, vector<1x32x128xf32>
    %195 = vector.shape_cast %194 : vector<1x32x128xf32> to vector<32x128xf32>
    %cst_70 = arith.constant dense<0.000000e+00> : vector<8x128xf32>
    %196 = tpu.matmul %192, %195, %cst_70 {dimension_numbers = #tpu.dot_dimension_numbers<[1], [0], [0], [1], [0, 0, 1, 1], [], []>} : vector<8x32xf32>, vector<32x128xf32>, vector<8x128xf32> -> vector<8x128xf32>
    %197 = arith.index_cast %arg1 : i32 to index
    %c0_71 = arith.constant 0 : index
    %c0_72 = arith.constant 0 : index
    %198 = vector.load %arg10[%197, %c0_71, %c0_72] : memref<2x1x128xf32, #tpu.memory_space<vmem>>, vector<1x1x128xf32>
    %199 = vector.shape_cast %198 : vector<1x1x128xf32> to vector<1x128xf32>
    %200 = vector.broadcast %199 : vector<1x128xf32> to vector<8x128xf32>
    %201 = arith.addf %196, %200 : vector<8x128xf32>
    %cst_73 = arith.constant 5.000000e-01 : f32
    %202 = vector.broadcast %cst_73 : f32 to vector<8x128xf32>
    %203 = arith.mulf %202, %201 : vector<8x128xf32>
    %204 = arith.mulf %201, %201 : vector<8x128xf32>
    %205 = arith.mulf %204, %201 : vector<8x128xf32>
    %cst_74 = arith.constant 4.471500e-02 : f32
    %206 = vector.broadcast %cst_74 : f32 to vector<8x128xf32>
    %207 = arith.mulf %206, %205 : vector<8x128xf32>
    %208 = arith.addf %201, %207 : vector<8x128xf32>
    %cst_75 = arith.constant 0.797884583 : f32
    %209 = vector.broadcast %cst_75 : f32 to vector<8x128xf32>
    %210 = arith.mulf %209, %208 : vector<8x128xf32>
    %211 = math.tanh %210 : vector<8x128xf32>
    %cst_76 = arith.constant 1.000000e+00 : f32
    %212 = vector.broadcast %cst_76 : f32 to vector<8x128xf32>
    %213 = arith.addf %212, %211 : vector<8x128xf32>
    %214 = arith.mulf %203, %213 : vector<8x128xf32>
    %215 = arith.index_cast %arg1 : i32 to index
    %c0_77 = arith.constant 0 : index
    %c0_78 = arith.constant 0 : index
    %216 = vector.load %arg9[%215, %c0_77, %c0_78] : memref<2x128x32xf32, #tpu.memory_space<vmem>>, vector<1x128x32xf32>
    %217 = vector.shape_cast %216 : vector<1x128x32xf32> to vector<128x32xf32>
    %cst_79 = arith.constant dense<0.000000e+00> : vector<8x32xf32>
    %218 = tpu.matmul %214, %217, %cst_79 {dimension_numbers = #tpu.dot_dimension_numbers<[1], [0], [0], [1], [0, 0, 1, 1], [], []>} : vector<8x128xf32>, vector<128x32xf32>, vector<8x32xf32> -> vector<8x32xf32>
    %219 = vector.broadcast %13 : vector<1x32xf32> to vector<8x32xf32>
    %220 = arith.addf %218, %219 : vector<8x32xf32>
    %221 = arith.addf %220, %192 : vector<8x32xf32>
    %cst_80 = arith.constant dense<0.000000e+00> : vector<8xf32>
    %222 = vector.multi_reduction <add>, %221, %cst_80 [1] : vector<8x32xf32> to vector<8xf32>
    %223 = vector.shape_cast %222 : vector<8xf32> to vector<8x1xf32>
    %cst_81 = arith.constant 3.200000e+01 : f32
    %224 = vector.broadcast %cst_81 : f32 to vector<8x1xf32>
    %225 = arith.divf %223, %224 : vector<8x1xf32>
    %226 = vector.broadcast %225 : vector<8x1xf32> to vector<8x32xf32>
    %227 = arith.subf %221, %226 : vector<8x32xf32>
    %228 = vector.broadcast %225 : vector<8x1xf32> to vector<8x32xf32>
    %229 = arith.subf %221, %228 : vector<8x32xf32>
    %230 = arith.mulf %227, %229 : vector<8x32xf32>
    %cst_82 = arith.constant dense<0.000000e+00> : vector<8xf32>
    %231 = vector.multi_reduction <add>, %230, %cst_82 [1] : vector<8x32xf32> to vector<8xf32>
    %232 = vector.shape_cast %231 : vector<8xf32> to vector<8x1xf32>
    %cst_83 = arith.constant 3.200000e+01 : f32
    %233 = vector.broadcast %cst_83 : f32 to vector<8x1xf32>
    %234 = arith.divf %232, %233 : vector<8x1xf32>
    %235 = vector.broadcast %225 : vector<8x1xf32> to vector<8x32xf32>
    %236 = arith.subf %221, %235 : vector<8x32xf32>
    %cst_84 = arith.constant 9.99999996E-13 : f32
    %237 = vector.broadcast %cst_84 : f32 to vector<8x1xf32>
    %238 = arith.addf %234, %237 : vector<8x1xf32>
    %239 = math.sqrt %238 : vector<8x1xf32>
    %240 = vector.broadcast %239 : vector<8x1xf32> to vector<8x32xf32>
    %241 = arith.divf %236, %240 : vector<8x32xf32>
    %242 = vector.broadcast %14 : vector<1x32xf32> to vector<8x32xf32>
    %243 = arith.mulf %242, %241 : vector<8x32xf32>
    %244 = vector.broadcast %15 : vector<1x32xf32> to vector<8x32xf32>
    %245 = arith.addf %243, %244 : vector<8x32xf32>
    %c0_85 = arith.constant 0 : index
    %c0_86 = arith.constant 0 : index
    %246 = vector.load %arg13[%c0_85, %c0_86] : memref<8x32xf32, #tpu.memory_space<vmem>>, vector<8x32xf32>
    tpu.vector_store %arg13[%c0_85, %c0_86], %245 {strides = array<i32>} : memref<8x32xf32, #tpu.memory_space<vmem>>, vector<8x32xf32>,
    %c1_i32_87 = arith.constant 1 : i32
    %247 = arith.cmpi eq, %arg1, %c1_i32_87 : i32
    %248 = arith.extui %247 : i1 to i32
    %c0_i32_88 = arith.constant 0 : i32
    %249 = arith.cmpi ne, %248, %c0_i32_88 : i32
    scf.if %249 {
      %c0_89 = arith.constant 0 : index
      %c0_90 = arith.constant 0 : index
      %c0_91 = arith.constant 0 : index
      %250 = vector.load %arg12[%c0_89, %c0_90, %c0_91] : memref<1x8x32xf32, #tpu.memory_space<vmem>>, vector<1x8x32xf32>
      %251 = vector.shape_cast %250 : vector<1x8x32xf32> to vector<8x32xf32>
      %252 = vector.shape_cast %245 : vector<8x32xf32> to vector<1x8x32xf32>
      tpu.vector_store %arg12[%c0_89, %c0_90, %c0_91], %252 {strides = array<i32>} : memref<1x8x32xf32, #tpu.memory_space<vmem>>, vector<1x8x32xf32>,
    } else {
    }
    return
  }
  func.func @transform_0(%arg0: i32, %arg1: i32) -> (i32, i32, i32) {
    %c0_i32 = arith.constant 0 : i32
    %c0_i32_0 = arith.constant 0 : i32
    %c0_i32_1 = arith.constant 0 : i32
    return %arg0, %c0_i32, %c0_i32_0 : i32, i32, i32
  }
  func.func @transform_1(%arg0: i32, %arg1: i32) -> (i32, i32) {
    %c0_i32 = arith.constant 0 : i32
    %c0_i32_0 = arith.constant 0 : i32
    %c0_i32_1 = arith.constant 0 : i32
    return %c0_i32, %c0_i32_0 : i32, i32
  }
  func.func @transform_2(%arg0: i32, %arg1: i32) -> (i32, i32, i32) {
    %c0_i32 = arith.constant 0 : i32
    %c0_i32_0 = arith.constant 0 : i32
    %c0_i32_1 = arith.constant 0 : i32
    return %arg0, %c0_i32, %c0_i32_0 : i32, i32, i32
  }
  func.func @transform_3(%arg0: i32, %arg1: i32) -> (i32, i32, i32) {
    %c0_i32 = arith.constant 0 : i32
    %c0_i32_0 = arith.constant 0 : i32
    %c0_i32_1 = arith.constant 0 : i32
    %c0_i32_2 = arith.constant 0 : i32
    return %c0_i32, %c0_i32_0, %c0_i32_1 : i32, i32, i32
  }
  func.func @transform_4(%arg0: i32, %arg1: i32) -> (i32, i32, i32) {
    %c0_i32 = arith.constant 0 : i32
    %c0_i32_0 = arith.constant 0 : i32
    %c0_i32_1 = arith.constant 0 : i32
    %c0_i32_2 = arith.constant 0 : i32
    return %c0_i32, %c0_i32_0, %c0_i32_1 : i32, i32, i32
  }
  func.func @transform_5(%arg0: i32, %arg1: i32) -> (i32, i32, i32) {
    %c0_i32 = arith.constant 0 : i32
    %c0_i32_0 = arith.constant 0 : i32
    %c0_i32_1 = arith.constant 0 : i32
    %c0_i32_2 = arith.constant 0 : i32
    return %c0_i32, %c0_i32_0, %c0_i32_1 : i32, i32, i32
  }
  func.func @transform_6(%arg0: i32, %arg1: i32) -> (i32, i32, i32) {
    %c0_i32 = arith.constant 0 : i32
    %c0_i32_0 = arith.constant 0 : i32
    %c0_i32_1 = arith.constant 0 : i32
    %c0_i32_2 = arith.constant 0 : i32
    return %c0_i32, %c0_i32_0, %c0_i32_1 : i32, i32, i32
  }
  func.func @transform_7(%arg0: i32, %arg1: i32) -> (i32, i32, i32) {
    %c0_i32 = arith.constant 0 : i32
    %c0_i32_0 = arith.constant 0 : i32
    %c0_i32_1 = arith.constant 0 : i32
    %c0_i32_2 = arith.constant 0 : i32
    return %c0_i32, %c0_i32_0, %c0_i32_1 : i32, i32, i32
  }
  func.func @transform_8(%arg0: i32, %arg1: i32) -> (i32, i32, i32) {
    %c0_i32 = arith.constant 0 : i32
    %c0_i32_0 = arith.constant 0 : i32
    %c0_i32_1 = arith.constant 0 : i32
    %c0_i32_2 = arith.constant 0 : i32
    return %c0_i32, %c0_i32_0, %c0_i32_1 : i32, i32, i32
  }
  func.func @transform_9(%arg0: i32, %arg1: i32) -> (i32, i32, i32) {
    %c0_i32 = arith.constant 0 : i32
    %c0_i32_0 = arith.constant 0 : i32
    %c0_i32_1 = arith.constant 0 : i32
    %c0_i32_2 = arith.constant 0 : i32
    return %c0_i32, %c0_i32_0, %c0_i32_1 : i32, i32, i32
  }
  func.func @transform_10(%arg0: i32, %arg1: i32) -> (i32, i32, i32) {
    %c0_i32 = arith.constant 0 : i32
    %c0_i32_0 = arith.constant 0 : i32
    %c0_i32_1 = arith.constant 0 : i32
    return %arg0, %c0_i32, %c0_i32_0 : i32, i32, i32
  }
}

</mosaic_0001>

<bundles_post_ra>
// kernel: tpu_custom_call.1
= control target key start
LH: loop header
LB: loop body
LE: loop exit
PB: predicated region body
PF: predicated region fallthrough
CT: control target
= control target key end

     0   :  { %s2874_s0 = inlined_call_operand.vmem [shape: f32[2,8,32], index: 0, kind: input, shape index: {}]   ;;  %s2875_s1 = inlined_call_operand.vmem [shape: f32[8,8], index: 1, kind: input, shape index: {}]   ;;  %s2876_s2 = inlined_call_operand.vmem [shape: f32[2,8,8], index: 2, kind: input, shape index: {}]   ;;  %s2877_s3 = inlined_call_operand.vmem [shape: f32[12,32,16], index: 3, kind: input, shape index: {}]   ;;  %s2878_s4 = inlined_call_operand.vmem [shape: f32[4,16,32], index: 4, kind: input, shape index: {}]   ;;  %s2879_s5 = inlined_call_operand.vmem [shape: f32[2,6,16], index: 5, kind: input, shape index: {}]   ;;  %s2880_s6 = inlined_call_operand.vmem [shape: f32[2,32,128], index: 6, kind: input, shape index: {}]   ;;  %s2881_s7 = inlined_call_operand.vmem [shape: f32[2,128,32], index: 7, kind: input, shape index: {}]   ;;  %s2882_s8 = inlined_call_operand.vmem [shape: f32[2,1,128], index: 8, kind: input, shape index: {}]   ;;  %s2883_s9 = inlined_call_operand.vmem [shape: f32[2,9,32], index: 9, kind: input, shape index: {}]   ;;  %s2884_s10 = inlined_call_operand.hbm [shape: f32[2,8,32], index: 10, kind: output, shape index: {}]  }
   0x1   :  { %2889 = sst [smem:[#allocation10_spill]] %s2874_s0 }
   0x2   :  { %15 = vsyncpa [#allocation4], 0 }
   0x3   :  { %17 = vsyncpa [#allocation4 + $0x1], 0  ;;  %s2494_s13 = smov 0   ;;  %s2496_s14 = smov 0  }
   0x4   :  { %s2498_s15 = smov 0   ;;  %s2500_s16 = smov 0  }
   0x5   :  { %s2502_s17 = smov 0   ;;  %s2504_s18 = smov 0  }
   0x6   :  { %s2506_s19 = smov 0   ;;  %s2508_s20 = smov 0  }
   0x7 LB: > { %2890 = sst [smem:[#allocation6_spill]] %s2425_s18  ;;  %s1882_s21 = sadd.s32 4294967295, %s2433_s20   ;;  %s2433_s20 = sphi %s2508_s20, %s23_s20   ;;  %s2429_s19 = sphi %s2506_s19, %s2901_s19   ;;  %s2425_s18 = sphi %s2504_s18, %s2900_s18   ;;  %s2421_s17 = sphi %s2502_s17, %s2899_s17   ;;  %s2417_s16 = sphi %s2500_s16, %s2898_s16   ;;  %s2413_s15 = sphi %s2498_s15, %s2904_s15   ;;  %s2409_s14 = sphi %s2496_s14, %s2903_s14   ;;  %s2405_s13 = sphi %s2494_s13, %s2902_s13  }
   0x8   : > { %2891 = sst [smem:[#allocation7_spill]] %s2429_s19  ;;  %s1883_s22 = sadd.s32 4294967294, %s2433_s20  }
   0x9   : > { %s32_s23 = sadd.s32 1, %s2425_s18  ;;  %s35_s24 = sadd.s32 1, %s2429_s19 }
   0xa   : > { %p33_p0 = scmp.ge.s32.totalorder %s32_s23, 2  ;;  %p272_p1 = scmp.ne.s32.totalorder %s2413_s15, %s2409_s14 }
   0xb   : > { %p273_p2 = scmp.eq.s32.totalorder %s1882_s21, 3  ;;  %p278_p4 = scmp.ne.s32.totalorder %s2409_s14, %s2405_s13 }
   0xc   : > { %s2906_s23 = smov (%p33_p0, %s32_s23), 0  ;;  %s2908_s24 = smov (!%p33_p0, %s35_s24), %s2429_s19 }
   0xd   : > { %2892 = sst [smem:[#allocation8_spill]] %s2906_s23  ;;  %p2543_p3 = por %p273_p2, %p272_p1 }
   0xe   : > { %p37_p5 = scmp.ge.s32.totalorder %s2908_s24, 2  ;;  %p279_p6 = scmp.eq.s32.totalorder %s1883_s22, 3 }
   0xf   : > { %p1886_p7 = scmp.ge.s32.totalorder %s2433_s20, 1  ;;  %p335_p8 = scmp.lt.s32.totalorder %s2433_s20, 5 }
  0x10   : > { %s2910_s24 = smov (%p37_p5, %s2908_s24), 0  ;;  %p2553_p9 = por %p279_p6, %p278_p4 }
  0x11   : > { %2894 = sst [smem:[#allocation9_spill]] %s2910_s24  ;;  %p336_p10 = pnand %p1886_p7, %p335_p8 }
  0x12   : > { %s259_s27 = ssub.s32 %s2429_s19, %s2910_s24  ;;  %s262_s28 = sadd.s32 1, %s2413_s15 }
  0x13   : > { %p260_p11 = scmp.eq.s32.totalorder %s259_s27, 0  ;;  %339 = sbr.rel (%p336_p10) target bundleno = 3128 (0xc38), region = 60 }
  0x14   : > { %s2888_s30 = sand.u32 (!%p336_p10), 1, %s2409_s14   ;;  %p376_p12 = scmp.lt.s32.totalorder (!%p336_p10), %s2421_s17, 1 }
  0x15   : > { %s2561_s29 = scalar_select %p260_p11, %s2413_s15, %s262_s28  }
  0x16   : > { %s2567_s11 = sshll.u32 (!%p336_p10), %s2888_s30, 3  ;;  %s2896_s0 = sld [smem:[#allocation10_spill]] (!%p336_p10) }
  0x17   : > { %s375_s18 = scalar_lea.vmem (!%p336_p10), [#allocation3], %s2567_s11  ;;  %p1890_p13 = scmp.ne.s32.totalorder (!%p336_p10), %s2417_s16, 0 }
  0x1a   : > { %s377_s12 = scalar_select %p376_p12, %s2421_s17, 1 }
  0x1b   : > { %387 = sbr.rel (%p1890_p13) target bundleno = 34 (0x22), region = 64  ;;  %vm389_vm0 = vcmask (!%p1890_p13), 261120  }
  0x1c   : > { %s1888_s21 = sshll.u32 %s377_s12, 3 }
  0x1d   : > { %s379_s24 = scalar_lea.vmem %s2896_s0, %s1888_s21  ;;  %s2576_s19 = scalar_lea.vmem %s2876_s2, %s1888_s21 }
  0x1e   : > { %v388_v0 = vld [vmem:[%s379_s24] sm:$0xff] (!%p1890_p13) }
  0x1f   : > { %390 = vst.msk [vmem:[#allocation2] sm:$0xff] (!%p1890_p13), %vm389_vm0, %v388_v0 }
  0x22 PF: > { %s1895_s30 = smul.u32 192, %s2417_s16  ;;  %v2435_v1 = vmov 0.0|0.0   ;;  %vm2436_vm1 = vmmov 0   ;;  %v2437_v2 = vmov 0.0   ;;  %vm479_vm2 = vcmask 261120   ;;  %v396_v22 = vld [vmem:[%s2875_s1] sm:$0xff] }
  0x23   : > { %2171 = vmatprep.subr.bf16.mxu1 %v2435_v1  ;;  %2033 = vmatprep.mubr.msk.f32.mxu1 %vm2436_vm1, %v2437_v2  ;;  %vm397_vm3 = vcmask 64512   ;;  %v472_v23 = vlaneseq  ;;  %s1893_s22 = sshll.u32 %s2417_s16, 3  ;;  %vm762_vm4 = vcmask 130048   ;;  %v2657_v42 = vld [vmem:[%s2576_s19] sm:$0xff]  ;;  %s1891_s12 = sshll.u32 %s2417_s16, 4 }
  0x24   : > { %s2587_s21 = scalar_lea.vmem %s2877_s3, %s1895_s30  ;;  %2020 = vmatprep.subr.mxu0 %v2437_v2  ;;  %2022 = vmatprep.mubr.msk.f32.mxu0 %vm2436_vm1, %v2437_v2  ;;  %s513_s23 = scalar_lea.vmem %s2879_s5, %s1893_s22 }
  0x25   : > { %v519_v4 = vld [vmem:[%s2587_s21] sm:$0xff]  ;;  %v520_v5 = vld [vmem:[%s2587_s21 + $0x8] sm:$0xff]  ;;  %v521_v6 = vld [vmem:[%s2587_s21 + $0x10] sm:$0xff]  ;;  %v2633_v24 = vshrl.u32 %v472_v23, 7  ;;  %s2665_s22 = scalar_lea.vmem %s2883_s9, %s1891_s12  ;;  %s1950_s19 = sshll.u32 %s2417_s16, 5 }
  0x26   : > { %v2589_v3 = vld [vmem:[#allocation2] sm:$0xff]  ;;  %v2172_v7 = vpack.c.bf16 %v520_v5, %v519_v4  ;;  %v522_v8 = vld [vmem:[%s2587_s21 + $0x18] sm:$0xff]  ;;  %v1899_v11 = vld [vmem:[%s2587_s21 + $0x48] sm:$0xff]  ;;  %s926_s28 = scalar_lea.vmem %s2878_s4, %s1950_s19  ;;  %s1525_s24 = scalar_lea.vmem %s2880_s6, %s1950_s19 }
  0x27   : > { %2021 = vmatpush3.msra.mxu0 %v2589_v3  ;;  %v2175_v9 = vpack.c.bf16 %v522_v8, %v521_v6  ;;  %v1898_v10 = vld [vmem:[%s2587_s21 + $0x40] sm:$0xff]  ;;  %v1900_v13 = vld [vmem:[%s2587_s21 + $0x50] sm:$0xff]  ;;  %v1901_v14 = vld [vmem:[%s2587_s21 + $0x58] sm:$0xff]  ;;  %v508_v27 = vsub.s32 2, %v2633_v24  ;;  %v474_v28 = vsub.s32 0, %v2633_v24  ;;  %v690_v36 = vsub.s32 4, %v2633_v24  ;;  %s1530_s12 = scalar_lea.vmem %s2882_s8, %s2417_s16 }
  0x28   : > { %2063 = vmatprep.subr.mxu0 %v2437_v2  ;;  %2173 = vmatpush3.bf16.msra.mxu1 %v2172_v7  ;;  %v2178_v12 = vpack.c.bf16 %v1899_v11, %v1898_v10  ;;  %v2181_v15 = vpack.c.bf16 %v1901_v14, %v1900_v13  ;;  %v1904_v16 = vld [vmem:[%s2587_s21 + $0x80] sm:$0xff]  ;;  %v1905_v17 = vld [vmem:[%s2587_s21 + $0x88] sm:$0xff]  ;;  %v1906_v19 = vld [vmem:[%s2587_s21 + $0x90] sm:$0xff]  ;;  %s1943_s30 = sshll.u32 %s2417_s16, 7  ;;  %p1945_p0 = scmp.ne.s32.totalorder %s2417_s16, 1 }
  0x29   : > { %2174 = vmatprep.subr.bf16.mxu1 %v2435_v1  ;;  %v2184_v18 = vpack.c.bf16 %v1905_v17, %v1904_v16  ;;  %v1907_v20 = vld [vmem:[%s2587_s21 + $0x98] sm:$0xff]  ;;  %2023 = vmatmul.mubr.msk.f32.vlgmr.msra.gmra.mrb[0].mxu0 %vm397_vm3, %v396_v22  ;;  %v2640_v29 = vld [vmem:[%s513_s23] sm:$0x3f]  ;;  %v1915_v62 = vld [vmem:[%s2587_s21 + $0x28] sm:$0xff] }
  0x2a   : > { %v2187_v21 = vpack.c.bf16 %v1907_v20, %v1906_v19  ;;  %2065 = vmatprep.mubr.msk.f32.mxu0 %vm2436_vm1, %v2437_v2  ;;  %v610_v30 = vrot.slane %v2640_v29, %v508_v27  ;;  %v526_v31 = vrot.slane %v2640_v29, %v474_v28  ;;  %v691_v37 = vrot.slane %v2640_v29, %v690_v36  ;;  %v2668_v49 = vld [vmem:[%s2665_s22] sm:$0xff]  ;;  %v1916_v0 = vld [vmem:[%s2587_s21 + $0x30] sm:$0xff]  ;;  %v1917_v4 = vld [vmem:[%s2587_s21 + $0x38] sm:$0xff] }
  0x2b   : > { %v475_v53 = vrot.slane %v2668_v49, %v474_v28  ;;  %v1914_v61 = vld [vmem:[%s2587_s21 + $0x20] sm:$0xff]  ;;  %v2193_v5 = vpack.c.bf16 %v1917_v4, %v1916_v0  ;;  %v1921_v11 = vld [vmem:[%s2587_s21 + $0x68] sm:$0xff]  ;;  %v1922_v17 = vld [vmem:[%s2587_s21 + $0x70] sm:$0xff] }
  0x2c   : > { %2176 = vmatpush3.bf16.msra.mxu1 %v2175_v9  ;;  %v2190_v63 = vpack.c.bf16 %v1915_v62, %v1914_v61  ;;  %v1920_v10 = vld [vmem:[%s2587_s21 + $0x60] sm:$0xff] }
  0x2d   : > { %2177 = vmatprep.subr.bf16.mxu1 %v2435_v1  ;;  %v2196_v14 = vpack.c.bf16 %v1921_v11, %v1920_v10  ;;  %v1936_v10 = vld [vmem:[%s926_s28 + $0x10] sm:$0xff]  ;;  %v1937_v11 = vld [vmem:[%s926_s28 + $0x18] sm:$0xff] }
  0x2f   : > { %2034 = vmatmul.mubr.msk.f32.vlgmr.msra.gmra.mrb[0].mxu1 %vm479_vm2, %v2589_v3 }
  0x30   : > { %2179 = vmatpush3.bf16.msra.mxu1 %v2178_v12  ;;  %2044 = vmatprep.mubr.msk.f32.mxu1 %vm2436_vm1, %v2437_v2 }
  0x31   : > { %2180 = vmatprep.subr.bf16.mxu1 %v2435_v1 }
  0x34   : > { %2182 = vmatpush3.bf16.msra.mxu1 %v2181_v15 }
  0x35   : > { %2183 = vmatprep.subr.bf16.mxu1 %v2435_v1 }
  0x37   : > { %2045 = vmatmul.mubr.msk.f32.vlgmr.msra.gmra.mrb[2].mxu1 %vm479_vm2, %v2589_v3 }
  0x38   : > { %2185 = vmatpush3.bf16.msra.mxu1 %v2184_v18  ;;  %2055 = vmatprep.mubr.msk.f32.mxu1 %vm2436_vm1, %v2437_v2  ;;  %v1923_v18 = vld [vmem:[%s2587_s21 + $0x78] sm:$0xff] }
  0x39   : > { %2186 = vmatprep.subr.bf16.mxu1 %v2435_v1  ;;  %v2199_v19 = vpack.c.bf16 %v1923_v18, %v1922_v17 }
  0x3c   : > { %2188 = vmatpush3.bf16.msra.mxu1 %v2187_v21 }
  0x3d   : > { %2058 = vmatprep.subr.mxu1 %v2437_v2 }
  0x3f   : > { %2056 = vmatmul.mubr.msk.f32.vlgmr.msra.gmra.mrb[4].mxu1 %vm479_vm2, %v2589_v3 }
  0x40   : > { %2060 = vmatprep.mubr.msk.f32.mxu1 %vm2436_vm1, %v2437_v2 }
  0xfc   : > { %v467_v47 = vpop.f32.mrb[0].mxu0 }
  0xfd   : > { %v2024_v48 = vpop.f32.mrb[1].mxu0  ;;  %v471_v52 = vsub.f32 %v2589_v3, %v467_v47 }
  0xff   : > { %v476_v55 = vmul.f32 %v475_v53, %v471_v52  ;;  %v1927_v52 = vld [vmem:[%s2587_s21 + $0xa8] sm:$0xff]  ;;  %v1928_v53 = vld [vmem:[%s2587_s21 + $0xb0] sm:$0xff] }
 0x101   : > { %v477_v56 = vadd.f32 %v476_v55, %v467_v47  ;;  %v1929_v55 = vld [vmem:[%s2587_s21 + $0xb8] sm:$0xff] }
 0x102   : > { %v596_v25 = vpop.f32.mrb[0].mxu1 }
 0x103   : > { %v2035_v26 = vpop.f32.mrb[1].mxu1  ;;  %v597_v35 = vadd.f32 %v596_v25, %v526_v31  ;;  %v478_v57 = vadd.f32 %v477_v56, %v2589_v3  ;;  %v2205_v56 = vpack.c.bf16 %v1929_v55, %v1928_v53  ;;  %v1514_v55 = vrot.slane %v2668_v49, %v690_v36 }
 0x105   : > { %v480_v60 = vsel %vm479_vm2, %v478_v57, 0.0 }
 0x10a   : > { %v677_v32 = vpop.f32.mrb[2].mxu1 }
 0x10b   : > { %v678_v33 = vadd.f32 %v677_v32, %v610_v30  ;;  %v2046_v34 = vpop.f32.mrb[3].mxu1 }
 0x10d   : > { %2059 = vmatpush3.xpose.msk.msra.mxu1 %vm762_vm4, %v678_v33  ;;  %v503_v33 = vsub.s32 1, %v2633_v24 }
 0x10e   : > { %2189 = vmatprep.subr.bf16.mxu1 %v2435_v1 }
 0x10f   : > { %v504_v34 = vrot.slane %v2668_v49, %v503_v33 }
 0x110   : > { %2061 = vmatmul.mubr.msk.f32.vlgmr.msra.gmra.mrb[6].mxu1 %vm762_vm4, %v597_v35 }
 0x111   : > { %2076 = vmatprep.mubr.msk.f32.mxu1 %vm2436_vm1, %v2437_v2  ;;  %2191 = vmatpush3.bf16.msra.mxu1 %v2190_v63 }
 0x112   : > { %v758_v38 = vpop.f32.mrb[4].mxu1  ;;  %2192 = vmatprep.subr.bf16.mxu1 %v2435_v1 }
 0x113   : > { %v759_v39 = vadd.f32 %v758_v38, %v691_v37  ;;  %v2057_v40 = vpop.f32.mrb[5].mxu1  ;;  %v509_v37 = vrot.slane %v2668_v49, %v508_v27 }
 0x115   : > { %2064 = vmatpush3.msra.mxu0 %v759_v39  ;;  %2194 = vmatpush3.bf16.msra.mxu1 %v2193_v5 }
 0x116   : > { %2195 = vmatprep.subr.bf16.mxu0 %v2435_v1  ;;  %2201 = vmatprep.subr.bf16.mxu1 %v2435_v1 }
 0x118   : > { %2077 = vmatmul.mubr.msk.f32.vlgmr.msra.gmra.mrb[8].mxu1 %vm479_vm2, %v2589_v3 }
 0x119   : > { %2098 = vmatprep.mubr.msk.f32.mxu1 %vm2436_vm1, %v2437_v2 }
 0x1e3   : > { %v835_v41 = vpop.f32.mrb[6].mxu1 }
 0x1e4   : > { %v839_v43 = vmul.f32 0.25, %v835_v41  ;;  %v2062_v44 = vpop.f32.mrb[7].mxu1 }
 0x1e5   : > { %v1019_v44 = vsub.s32 3, %v2633_v24 }
 0x1e6   : > { %v840_v45 = vadd.f32 %v839_v43, %v2657_v42 }
 0x1e8   : > { %v841_v46 = vsel %vm397_vm3, %v840_v45, -inf }
 0x1e9   : > { %842 = vmax.xlane.f32.xlu0 %v841_v46  ;;  %v939_v46 = vrot.slane %v2640_v29, %v503_v33 }
 0x1eb   : > { %v1006_v20 = vpop.f32.mrb[8].mxu1 }
 0x1ec   : > { %v2078_v21 = vpop.f32.mrb[9].mxu1 }
 0x276   : > { %v843_v50 = vpop.xlane.xlu0 %842 }
 0x277   : > { %v844_v51 = vsub.f32 %v840_v45, %v843_v50  ;;  %v1020_v45 = vrot.slane %v2640_v29, %v1019_v44  ;;  %v1007_v50 = vadd.f32 %v1006_v20, %v939_v46 }
 0x279   : > { %v845_v54 = vmul.f32 1.442695, %v844_v51  ;;  %v1926_v51 = vld [vmem:[%s2587_s21 + $0xa0] sm:$0xff] }
 0x27b   : > { %2317 = vpow2.f32 %v845_v54  ;;  %v2202_v54 = vpack.c.bf16 %v1927_v52, %v1926_v51 }
 0x27d   : > { %2203 = vmatpush3.bf16.msra.mxu1 %v2202_v54 }
 0x27e   : > { %2204 = vmatprep.subr.bf16.mxu1 %v2435_v1 }
 0x281   : > { %2206 = vmatpush3.bf16.msra.mxu1 %v2205_v56 }
 0x282   : > { %2207 = vmatprep.subr.bf16.mxu1 %v2435_v1 }
 0x284   : > { %2099 = vmatmul.mubr.msk.f32.vlgmr.msra.gmra.mrb[10].mxu1 %vm479_vm2, %v2589_v3 }
 0x285   : > { %v2318_v58 = vpop.eup %2317  ;;  %2115 = vmatprep.mubr.msk.f32.mxu1 %vm2436_vm1, %v2437_v2 }
 0x286   : > { %v847_v59 = vsel %vm397_vm3, %v2318_v58, 0.0 }
 0x287   : > { %848 = vadd.xlane.f32.xlu0 %v847_v59 }
 0x28b   : > { %481 = vadd.xlane.f32.xlu0 %v480_v60 }
 0x314   : > { %v849_v6 = vpop.xlane.xlu0 %848 }
 0x315   : > { %2319 = vrcp.f32 %v849_v6  ;;  %v1100_v6 = vsub.s32 5, %v2633_v24 }
 0x318   : > { %v482_v7 = vpop.xlane.xlu0 %481 }
 0x319   : > { %v484_v8 = vmul.f32 0.03125, %v482_v7  ;;  %v1101_v7 = vrot.slane %v2640_v29, %v1100_v6  ;;  %v927_v29 = vld [vmem:[%s926_s28] sm:$0xff] }
 0x31b   : > { %v485_v9 = vsub.f32 %v478_v57, %v484_v8 }
 0x31d   : > { %v486_v12 = vmul.f32 %v485_v9, %v485_v9 }
 0x31f   : > { %v2320_v13 = vpop.eup %2319  ;;  %v487_v15 = vsel %vm479_vm2, %v486_v12, 0.0  ;;  %v2208_v12 = vpack.c.bf16 %v1937_v11, %v1936_v10 }
 0x320   : > { %v851_v16 = vmul.f32 %v2320_v13, %v2318_v58  ;;  %488 = vadd.xlane.f32.xlu0 %v487_v15 }
 0x321   : > { %2209 = vmatpush3.bf16.msra.mxu1 %v2208_v12 }
 0x322   : > { %2066 = vmatmul.mubr.msk.f32.vlgmr.msra.gmra.mrb[2].mxu0 %vm397_vm3, %v851_v16  ;;  %2213 = vmatprep.subr.bf16.mxu1 %v2435_v1 }
 0x323   : > { %2197 = vmatpush3.bf16.msra.mxu0 %v2196_v14  ;;  %2087 = vmatprep.mubr.msk.f32.mxu0 %vm2436_vm1, %v2437_v2  ;;  %v928_v14 = vld [vmem:[%s926_s28 + $0x8] sm:$0xff]  ;;  %s2770_s28 = scalar_lea.vmem %s2881_s7, %s1943_s30 }
 0x324   : > { %2198 = vmatprep.subr.bf16.mxu0 %v2435_v1  ;;  %v2211_v16 = vpack.c.bf16 %v928_v14, %v927_v29  ;;  %v1625_v36 = vld [vmem:[%s2770_s28 + $0x18] sm:$0xff]  ;;  %v1631_v10 = vld [vmem:[%s2770_s28 + $0x48] sm:$0xff]  ;;  %v1632_v12 = vld [vmem:[%s2770_s28 + $0x50] sm:$0xff] }
 0x325   : > { %v1634_v14 = vld [vmem:[%s2770_s28 + $0x60] sm:$0xff] }
 0x327   : > { %2200 = vmatpush3.bf16.msra.mxu0 %v2199_v19 }
 0x328   : > { %2101 = vmatprep.subr.mxu0 %v2437_v2 }
 0x32a   : > { %2088 = vmatmul.mubr.msk.f32.vlgmr.msra.gmra.mrb[4].mxu0 %vm479_vm2, %v2589_v3 }
 0x32b   : > { %2103 = vmatprep.mubr.msk.f32.mxu0 %vm2436_vm1, %v2437_v2 }
 0x3ad   : > { %v489_v22 = vpop.xlane.xlu0 %488 }
 0x3ae   : > { %v490_v23 = vmul.f32 0.03125, %v489_v22  ;;  %v1488_v22 = vrot.slane %v2668_v49, %v1019_v44  ;;  %v1622_v44 = vld [vmem:[%s2770_s28] sm:$0xff] }
 0x3b0   : > { %v491_v25 = vadd.f32 1e-12, %v490_v23 }
 0x3b2   : > { %2321 = vrsqrt.f32 %v491_v25  ;;  %vm494_vm5 = vcmp.eq.f32.partialorder %v491_v25, inf  ;;  %v497_v28 = vand.u32 2147483648, %v491_v25  ;;  %vm496_vm6 = vcmp.eq.f32.partialorder %v491_v25, 0.0 }
 0x3bc   : > { %v2322_v26 = vpop.eup %2321 }
 0x3bd   : > { %v493_v30 = vmul.f32 %v2322_v26, %v491_v25 }
 0x3bf   : > { %v495_v31 = vsel %vm494_vm5, %v491_v25, %v493_v30 }
 0x3c0   : > { %v498_v32 = vsel %vm496_vm6, %v497_v28, %v495_v31 }
 0x3c1   : > { %2323 = vrcp.f32 %v498_v32 }
 0x3cb   : > { %v2324_v35 = vpop.eup %2323 }
 0x3cc   : > { %v500_v38 = vmul.f32 %v2324_v35, %v485_v9 }
 0x3ce   : > { %v505_v39 = vmul.f32 %v504_v34, %v500_v38  ;;  %v1527_v38 = vld [vmem:[%s1525_s24 + $0x8] sm:$0xff] }
 0x3d0   : > { %v2704_v40 = vadd.f32 %v509_v37, %v505_v39  ;;  %v1526_v37 = vld [vmem:[%s1525_s24] sm:$0xff]  ;;  %v1528_v39 = vld [vmem:[%s1525_s24 + $0x10] sm:$0xff] }
 0x3f5   : > { %v2706_v41 = vpop.f32.mrb[2].mxu0 }
 0x3f6   : > { %v2067_v43 = vpop.f32.mrb[3].mxu0 }
 0x3fd   : > { %v1087_v27 = vpop.f32.mrb[4].mxu0 }
 0x3fe   : > { %v1088_v47 = vadd.f32 %v1087_v27, %v1020_v45  ;;  %v2089_v48 = vpop.f32.mrb[5].mxu0  ;;  %v1623_v45 = vld [vmem:[%s2770_s28 + $0x8] sm:$0xff] }
 0x3ff   : > { %v2220_v46 = vpack.c.bf16 %v1623_v45, %v1622_v44 }
 0x400   : > { %2102 = vmatpush3.xpose.msk.msra.mxu0 %vm762_vm4, %v1088_v47 }
 0x401   : > { %2106 = vmatprep.subr.mxu0 %v2437_v2 }
 0x403   : > { %2104 = vmatmul.mubr.msk.f32.vlgmr.msra.gmra.mrb[6].mxu0 %vm762_vm4, %v1007_v50 }
 0x404   : > { %2108 = vmatprep.mubr.msk.f32.mxu0 %vm2436_vm1, %v2437_v2 }
 0x4d6   : > { %v1244_v57 = vpop.f32.mrb[6].mxu0 }
 0x4d7   : > { %v1248_v58 = vmul.f32 0.25, %v1244_v57  ;;  %v2105_v59 = vpop.f32.mrb[7].mxu0  ;;  %v1519_v57 = vrot.slane %v2668_v49, %v1100_v6  ;;  %v1627_v6 = vld [vmem:[%s2770_s28 + $0x28] sm:$0xff] }
 0x4d9   : > { %v1249_v60 = vadd.f32 %v1248_v58, %v2657_v42  ;;  %v1168_v42 = vpop.f32.mrb[10].mxu1 }
 0x4da   : > { %v2100_v8 = vpop.f32.mrb[11].mxu1  ;;  %v1169_v9 = vadd.f32 %v1168_v42, %v1101_v7  ;;  %v1629_v42 = vld [vmem:[%s2770_s28 + $0x38] sm:$0xff] }
 0x4db   : > { %v1250_v61 = vsel %vm397_vm3, %v1249_v60, -inf }
 0x4dc   : > { %1251 = vmax.xlane.f32.xlu1 %v1250_v61  ;;  %2107 = vmatpush3.msra.mxu0 %v1169_v9  ;;  %v1521_v61 = vmul.f32 0.7, %v2704_v40  ;;  %v1628_v40 = vld [vmem:[%s2770_s28 + $0x30] sm:$0xff]  ;;  %v1630_v9 = vld [vmem:[%s2770_s28 + $0x40] sm:$0xff] }
 0x4dd   : > { %2210 = vmatprep.subr.bf16.mxu0 %v2435_v1  ;;  %v2229_v8 = vpack.c.bf16 %v1629_v42, %v1628_v40  ;;  %v2232_v11 = vpack.c.bf16 %v1631_v10, %v1630_v9 }
 0x569   : > { %v1252_v62 = vpop.xlane.xlu1 %1251 }
 0x56a   : > { %v1253_v63 = vsub.f32 %v1249_v60, %v1252_v62 }
 0x56c   : > { %v1254_v0 = vmul.f32 1.442695, %v1253_v63 }
 0x56e   : > { %2325 = vpow2.f32 %v1254_v0  ;;  %v1624_v0 = vld [vmem:[%s2770_s28 + $0x10] sm:$0xff] }
 0x578   : > { %v2326_v4 = vpop.eup %2325 }
 0x579   : > { %v1256_v5 = vsel %vm397_vm3, %v2326_v4, 0.0 }
 0x57a   : > { %1257 = vadd.xlane.f32.xlu1 %v1256_v5  ;;  %v1626_v5 = vld [vmem:[%s2770_s28 + $0x20] sm:$0xff] }
 0x57b   : > { %v2226_v7 = vpack.c.bf16 %v1627_v6, %v1626_v5 }
 0x607   : > { %v1258_v13 = vpop.xlane.xlu1 %1257 }
 0x608   : > { %2327 = vrcp.f32 %v1258_v13  ;;  %v1633_v13 = vld [vmem:[%s2770_s28 + $0x58] sm:$0xff] }
 0x609   : > { %v2235_v29 = vpack.c.bf16 %v1633_v13, %v1632_v12 }
 0x612   : > { %v2328_v15 = vpop.eup %2327 }
 0x613   : > { %v1260_v17 = vmul.f32 %v2328_v15, %v2326_v4  ;;  %v2223_v4 = vpack.c.bf16 %v1625_v36, %v1624_v0  ;;  %v1635_v15 = vld [vmem:[%s2770_s28 + $0x68] sm:$0xff] }
 0x615   : > { %2109 = vmatmul.mubr.msk.f32.vlgmr.msra.gmra.mrb[8].mxu0 %vm397_vm3, %v1260_v17  ;;  %v1636_v17 = vld [vmem:[%s2770_s28 + $0x70] sm:$0xff] }
 0x616   : > { %2212 = vmatpush3.bf16.msra.mxu0 %v2211_v16  ;;  %2122 = vmatprep.mubr.msk.f32.mxu0 %vm2436_vm1, %v2437_v2  ;;  %v2238_v16 = vpack.c.bf16 %v1635_v15, %v1634_v14 }
 0x617   : > { %2219 = vmatprep.subr.bf16.mxu0 %v2435_v1 }
 0x619   : > { %2123 = vmatmul.mubr.msk.f32.vlgmr.msra.gmra.mrb[10].mxu0 %vm762_vm4, %v2706_v41  ;;  %v1529_v41 = vld [vmem:[%s1525_s24 + $0x18] sm:$0xff] }
 0x61a   : > { %2168 = vmatprep.mubr.msk.f32.mxu0 %vm2436_vm1, %v2437_v2  ;;  %v2217_v43 = vpack.c.bf16 %v1529_v41, %v1528_v39  ;;  %2221 = vmatpush3.bf16.msra.mxu0 %v2220_v46 }
 0x61b   : > { %2222 = vmatprep.subr.bf16.mxu0 %v2435_v1 }
 0x61e   : > { %2224 = vmatpush3.bf16.msra.mxu0 %v2223_v4 }
 0x61f   : > { %2225 = vmatprep.subr.bf16.mxu0 %v2435_v1 }
 0x622   : > { %2227 = vmatpush3.bf16.msra.mxu0 %v2226_v7 }
 0x623   : > { %2228 = vmatprep.subr.bf16.mxu0 %v2435_v1 }
 0x626   : > { %2230 = vmatpush3.bf16.msra.mxu0 %v2229_v8 }
 0x627   : > { %2231 = vmatprep.subr.bf16.mxu0 %v2435_v1 }
 0x62a   : > { %2233 = vmatpush3.bf16.msra.mxu0 %v2232_v11 }
 0x62b   : > { %2234 = vmatprep.subr.bf16.mxu0 %v2435_v1 }
 0x62e   : > { %2236 = vmatpush3.bf16.msra.mxu0 %v2235_v29 }
 0x62f   : > { %2237 = vmatprep.subr.bf16.mxu0 %v2435_v1 }
 0x632   : > { %2239 = vmatpush3.bf16.msra.mxu0 %v2238_v16 }
 0x633   : > { %2240 = vmatprep.subr.bf16.mxu0 %v2435_v1 }
 0x6e8   : > { %v1330_v18 = vpop.f32.mrb[8].mxu0 }
 0x6e9   : > { %v2110_v19 = vpop.f32.mrb[9].mxu0  ;;  %2116 = vmatmul.mubr.msk.f32.vlgmr.msra.gmra.mrb[12].mxu1 %vm762_vm4, %v1330_v18  ;;  %v1637_v18 = vld [vmem:[%s2770_s28 + $0x78] sm:$0xff] }
 0x6ea   : > { %2133 = vmatprep.mubr.msk.f32.mxu1 %vm2436_vm1, %v2437_v2  ;;  %v2241_v19 = vpack.c.bf16 %v1637_v18, %v1636_v17 }
 0x6ec   : > { %v1481_v20 = vpop.f32.mrb[10].mxu0  ;;  %2242 = vmatpush3.bf16.msra.mxu0 %v2241_v19 }
 0x6ed   : > { %v2124_v21 = vpop.f32.mrb[11].mxu0 }
 0x7bc   : > { %v1408_v23 = vpop.f32.mrb[12].mxu1 }
 0x7bd   : > { %v1482_v25 = vadd.f32 %v1481_v20, %v1408_v23  ;;  %v2117_v26 = vpop.f32.mrb[13].mxu1  ;;  %v1941_v20 = vld [vmem:[%s1530_s12] ss:$0 sm:$0xff] }
 0x7bf   : > { %v1489_v28 = vadd.f32 %v1488_v22, %v1482_v25 }
 0x7c1   : > { %v1490_v30 = vadd.f32 %v1489_v28, %v2589_v3  ;;  %v2214_v3 = vpack.c.bf16 %v1527_v38, %v1526_v37 }
 0x7c3   : > { %v1491_v31 = vsel %vm479_vm2, %v1490_v30, 0.0  ;;  %2215 = vmatpush3.bf16.msra.mxu1 %v2214_v3 }
 0x7c4   : > { %1492 = vadd.xlane.f32.xlu1 %v1491_v31  ;;  %2216 = vmatprep.subr.bf16.mxu1 %v2435_v1  ;;  %v1640_v1 = vsub.s32 6, %v2633_v24 }
 0x7c7   : > { %2218 = vmatpush3.bf16.msra.mxu1 %v2217_v43 }
 0x851   : > { %v1493_v32 = vpop.xlane.xlu1 %1492 }
 0x852   : > { %v1494_v33 = vmul.f32 0.03125, %v1493_v32 }
 0x854   : > { %v1495_v2 = vsub.f32 %v1490_v30, %v1494_v33 }
 0x856   : > { %v1496_v34 = vmul.f32 %v1495_v2, %v1495_v2 }
 0x858   : > { %v1497_v35 = vsel %vm479_vm2, %v1496_v34, 0.0 }
 0x859   : > { %1498 = vadd.xlane.f32.xlu1 %v1497_v35  ;;  %v1641_v35 = vrot.slane %v2668_v49, %v1640_v1 }
 0x8e6   : > { %v1499_v27 = vpop.xlane.xlu1 %1498 }
 0x8e7   : > { %v1500_v47 = vmul.f32 0.03125, %v1499_v27 }
 0x8e9   : > { %v1501_v48 = vadd.f32 1e-12, %v1500_v47 }
 0x8eb   : > { %2329 = vrsqrt.f32 %v1501_v48  ;;  %vm1504_vm7 = vcmp.eq.f32.partialorder %v1501_v48, inf  ;;  %v1507_v52 = vand.u32 2147483648, %v1501_v48  ;;  %vm1506_vm8 = vcmp.eq.f32.partialorder %v1501_v48, 0.0 }
 0x8f5   : > { %v2330_v50 = vpop.eup %2329 }
 0x8f6   : > { %v1503_v51 = vmul.f32 %v2330_v50, %v1501_v48 }
 0x8f8   : > { %v1505_v53 = vsel %vm1504_vm7, %v1501_v48, %v1503_v51 }
 0x8f9   : > { %v1508_v54 = vsel %vm1506_vm8, %v1507_v52, %v1505_v53 }
 0x8fa   : > { %2331 = vrcp.f32 %v1508_v54 }
 0x904   : > { %v2332_v56 = vpop.eup %2331 }
 0x905   : > { %v1510_v58 = vmul.f32 %v2332_v56, %v1495_v2  ;;  %v1735_v56 = vsub.s32 7, %v2633_v24 }
 0x907   : > { %v1515_v59 = vmul.f32 %v1514_v55, %v1510_v58 }
 0x909   : > { %v1520_v60 = vadd.f32 %v1519_v57, %v1515_v59  ;;  %v1736_v57 = vrot.slane %v2668_v49, %v1735_v56 }
 0x90b   : > { %v1522_v62 = vmul.f32 0.3, %v1520_v60  ;;  %v1944_v60 = vld [vmem:[%s2665_s22 + $0x8] ss:$0 sm:$0xff] }
 0x90d   : > { %v1523_v63 = vadd.f32 %v1522_v62, %v1521_v61 }
 0x90f   : > { %2134 = vmatmul.mubr.msk.f32.vlgmr.msra.gmra.mrb[14].mxu1 %vm479_vm2, %v1523_v63 }
 0x9e2   : > { %v1607_v21 = vpop.f32.mrb[14].mxu1 }
 0x9e3   : > { %v1608_v22 = vadd.f32 %v1941_v20, %v1607_v21  ;;  %v2135_v23 = vpop.f32.mrb[15].mxu1 }
 0x9e5   : > { %v1612_v25 = vmul.f32 %v1608_v22, %v1608_v22  ;;  %v1611_v33 = vmul.f32 0.5, %v1608_v22 }
 0x9e7   : > { %v1613_v26 = vmul.f32 %v1612_v25, %v1608_v22 }
 0x9e9   : > { %v1614_v28 = vmul.f32 0.044715, %v1613_v26 }
 0x9eb   : > { %v1615_v30 = vadd.f32 %v1614_v28, %v1608_v22 }
 0x9ed   : > { %v1616_v31 = vmul.f32 0.7978846, %v1615_v30 }
 0x9ef   : > { %2333 = vtanh.f32 %v1616_v31 }
 0x9f9   : > { %v2334_v32 = vpop.eup %2333 }
 0x9fa   : > { %v1618_v2 = vadd.f32 1.0, %v2334_v32 }
 0x9fc   : > { %v1619_v34 = vmul.f32 %v1618_v2, %v1611_v33 }
 0x9fe   : > { %2169 = vmatmul.mubr.f32.vlgmr.msra.gmra.mrb[12].mxu0 %v1619_v34 }
 0xad1   : > { %v1708_v37 = vpop.f32.mrb[12].mxu0 }
 0xad2   : > { %v1709_v38 = vadd.f32 %v1708_v37, %v1641_v35  ;;  %v2170_v39 = vpop.f32.mrb[13].mxu0 }
 0xad4   : > { %v1712_v3 = vadd.f32 %v1709_v38, %v1523_v63 }
 0xad6   : > { %v1713_v41 = vsel %vm479_vm2, %v1712_v3, 0.0 }
 0xad7   : > { %1714 = vadd.xlane.f32.xlu0 %v1713_v41 }
 0xb64   : > { %v1715_v43 = vpop.xlane.xlu0 %1714 }
 0xb65   : > { %v1716_v44 = vmul.f32 0.03125, %v1715_v43 }
 0xb67   : > { %v1717_v45 = vsub.f32 %v1712_v3, %v1716_v44 }
 0xb69   : > { %v1718_v46 = vmul.f32 %v1717_v45, %v1717_v45 }
 0xb6b   : > { %v1719_v27 = vsel %vm479_vm2, %v1718_v46, 0.0 }
 0xb6c   : > { %1720 = vadd.xlane.f32.xlu1 %v1719_v27 }
 0xbf9   : > { %v1721_v47 = vpop.xlane.xlu1 %1720 }
 0xbfa   : > { %v1722_v48 = vmul.f32 0.03125, %v1721_v47 }
 0xbfc   : > { %v1723_v50 = vadd.f32 1e-12, %v1722_v48 }
 0xbfe   : > { %2335 = vrsqrt.f32 %v1723_v50  ;;  %vm1726_vm9 = vcmp.eq.f32.partialorder %v1723_v50, inf  ;;  %v1729_v53 = vand.u32 2147483648, %v1723_v50  ;;  %vm1728_vm10 = vcmp.eq.f32.partialorder %v1723_v50, 0.0 }
 0xc08   : > { %v2336_v51 = vpop.eup %2335 }
 0xc09   : > { %v1725_v52 = vmul.f32 %v2336_v51, %v1723_v50 }
 0xc0b   : > { %v1727_v54 = vsel %vm1726_vm9, %v1723_v50, %v1725_v52 }
 0xc0c   : > { %v1730_v55 = vsel %vm1728_vm10, %v1729_v53, %v1727_v54 }
 0xc0d   : > { %2337 = vrcp.f32 %v1730_v55 }
 0xc17   : > { %v2338_v58 = vpop.eup %2337 }
 0xc18   : > { %v1732_v59 = vmul.f32 %v2338_v58, %v1717_v45  ;;  %1747 = sbr.rel (%p1945_p0) target bundleno = 3103 (0xc1f), region = 68 }
 0xc1a   : > { %v1737_v61 = vmul.f32 %v1736_v57, %v1732_v59 }
 0xc1c   : > { %v1742_v62 = vadd.f32 %v1944_v60, %v1737_v61 }
 0xc1e   : > { %1743 = vst.msk [vmem:[#allocation2] sm:$0xff] %vm479_vm2, %v1742_v62  ;;  %1748 = vst.msk [vmem:[%s375_s18] sm:$0xff] (!%p1945_p0), %vm479_vm2, %v1742_v62 }
 0xc1f PF: > { %s1947_s24 = sshll.u32 %s2421_s17, 7  ;;  %s1763_s27 = sshll.u32 %s375_s18, 4  ;;  %s1764_s27 = int_to_ptr.vmem [resolvable:$true] %s1763_s27 }
 0xc20   : > { %s2823_s22 = scalar_lea.hbm %s2884_s10, %s1947_s24  ;;  %s2897_s16 = sand.u32 1, %s2409_s14  }
 0xc21   : > { %s1750_s28 = scalar_lea.sflag [#allocation4], %s2897_s16  ;;  %s2339_s19 = scalar_lea.vmem %s1764_s27, 128 }
 0xc22   : > { %p2340_p1 = scmp.ne.s32.totalorder %s1764_s27, %s2339_s19  ;;  %s2438_s23 = smov [#allocation3]  }
 0xc23   : > { %s2343_s12 = sshll.u32 %s2438_s23, 4  ;;  %s2344_s12 = int_to_ptr.vmem [resolvable:$false] %s2343_s12 }
 0xc24   : > { %p2341_p2 = pnand %p2340_p1, %p2543_p3  ;;  %s2345_s0 = scalar_lea.vmem %s2344_s12, 256 }
 0xc25   : > { %p2346_p5 = scmp.lt.s32.totalorder %s1764_s27, %s2344_s12  ;;  %p2347_p6 = scmp.lt.s32.totalorder %s2345_s0, %s2339_s19 }
 0xc26   : > { %p2342_p4 = pneg %p2341_p2 }
 0xc27   : > { %p2348_p7 = por %p2347_p6, %p2346_p5 }
 0xc29   : > { %p2349_p8 = pnand %p2348_p7, %p2342_p4 }
 0xc2b   : > { %2352 = shalt.err (!%p2349_p8)
}
 0xc2c   : > { %s2353_s17 = scalar_lea.hbm %s2823_s22, 128  ;;  %s2357_s24 = scalar_lea.hbm %s2884_s10, 256 }
 0xc2d   : > { %p2354_p10 = scmp.ne.s32.totalorder %s2823_s22, %s2353_s17  ;;  %p2358_p13 = scmp.lt.u32.totalorder %s2823_s22, %s2884_s10 }
 0xc2e   : > { %p2359_p0 = scmp.lt.u32.totalorder %s2357_s24, %s2353_s17  ;;  %p2361_p2 = scmp.lt.u32.totalorder %s2353_s17, %s2823_s22 }
 0xc2f   : > { %p2355_p11 = pnand %p2354_p10, %p2543_p3 }
 0xc30   : > { %p2360_p1 = por %p2359_p0, %p2358_p13 }
 0xc31   : > { %p2356_p12 = pneg %p2355_p11 }
 0xc32   : > { %p2362_p4 = por %p2361_p2, %p2360_p1 }
 0xc34   : > { %p2363_p5 = pnand %p2362_p4, %p2356_p12 }
 0xc36   : > { %2366 = shalt.err (!%p2363_p5)
}
 0xc37   : > { %2243 = dma.vmem_to_hbm [thread:$0]  (%p2543_p3), %s1764_s27, 128, %s2823_s22, %s1750_s28  }
 0xc38 PF: > { %p2249_p6 = scmp.ge.s32.totalorder %s2433_s20, 2  ;;  %s1775_s0 = sand.u32 1, %s2405_s13  }
 0xc39   : > { %s1776_s16 = scalar_lea.sflag [#allocation4], %s1775_s0 }
 0xc3a   : > { %p2246_p7 = pnand %p2249_p6, %p2553_p9 }
 0xc3c   : > { %2400 = dma.done.wait (!%p2246_p7), %s1776_s16, 128  }
 0xc3d   : > { %2402 = vsyncadd (!%p2246_p7), %s1776_s16, 4294967168  ;;  %s23_s20 = sadd.s32 1, %s2433_s20   ;;  %s2898_s16 = sld [smem:[#allocation6_spill]] }
 0xc3e   : > { %p20_p8 = scmp.ge.s32.totalorder %s23_s20, 6   ;;  %s2899_s17 = sld [smem:[#allocation7_spill]] }
 0xc3f   : > { %s2900_s18 = sld [smem:[#allocation8_spill]]  ;;  %s2901_s19 = sld [smem:[#allocation9_spill]] }
 0xc40   : > { %s2902_s13 = smov %s2409_s14  ;;  %s2903_s14 = smov %s2413_s15 }
 0xc41   : > { %s2904_s15 = smov %s2561_s29  ;;  %22 = sbr.rel (!%p20_p8) target bundleno = 7 (0x7), region = 119 }
 0xc48   :  { %1781 = vsyncpa [#allocation4], 1 }
 0xc49   :  { %1783 = vsyncpa [#allocation4 + $0x1], 1 }

</bundles_post_ra>
